<compile_context>
chip_gen: v7x
topology: tpu7x:2x2x1
jax: 0.10.0
libtpu: 0.0.40
codegen_flags: <defaults>
</compile_context>

<pallas_src>
import jax
import jax.numpy as jnp
from jax.experimental import pallas as pl
from jax.experimental.pallas import tpu as pltpu

EPS = 1e-5
K_IN = 28 * 28            # 784 (no K padding; full-extent block on this dim)
N1, N2, N3 = 512, 256, 128
N_OUT = 10
N_OUT_PAD = 128           # lane-dense final layer / output
BIAS_LEN = N1 + N2 + N3 + N_OUT_PAD   # 1024


def mlp_kernel(x_ref, w1_ref, w2_ref, w3_ref, w4_ref, bias_ref, o_ref):
    # Static, lane-aligned slices of the fused bias row (one DMA upstream).
    b1 = bias_ref[:, 0:N1]                         # (1, 512)
    b2 = bias_ref[:, N1:N1 + N2]                   # (1, 256)
    b3 = bias_ref[:, N1 + N2:N1 + N2 + N3]         # (1, 128)
    b4 = bias_ref[:, N1 + N2 + N3:BIAS_LEN]        # (1, 128)

    # Linear(784->512) + ReLU   (x already bf16; BN1 folded into w2/b2)
    h = jnp.dot(x_ref[...], w1_ref[...],
                preferred_element_type=jnp.float32) + b1
    h = jnp.maximum(h, 0.0)

    # Linear(512->256) (BN1 folded in) + ReLU   (BN2 folded into w3/b3)
    h = jnp.dot(h.astype(jnp.bfloat16), w2_ref[...],
                preferred_element_type=jnp.float32) + b2
    h = jnp.maximum(h, 0.0)

    # Linear(256->128) (BN2 folded in) + ReLU
    h = jnp.dot(h.astype(jnp.bfloat16), w3_ref[...],
                preferred_element_type=jnp.float32) + b3
    h = jnp.maximum(h, 0.0)

    # Linear(128->10), zero-padded to 128 output lanes (sliced in wrapper)
    out = jnp.dot(h.astype(jnp.bfloat16), w4_ref[...],
                  preferred_element_type=jnp.float32) + b4
    o_ref[...] = out.astype(o_ref.dtype)           # bf16 lane-dense store


def _choose_batch_block(B):
    """Batch tile: large enough to amortize ~0.35us/grid-step, >=2 grid steps
    when feasible (v7x has 2 TensorCores), minimal batch padding."""
    b8 = max(8, ((B + 7) // 8) * 8)          # round batch up to sublane multiple
    if b8 <= 16:
        return b8                            # tiny batch: one small tile
    if b8 <= 2048:
        # Exactly two grid steps with minimal padding: tb = ceil(b8/2) -> mult of 8.
        return ((b8 + 15) // 16) * 8
    # Large batch: 512..1024-row tiles; minimize padding, then prefer bigger tiles.
    best_tb, best_key = 512, None
    for tb in range(512, 1025, 8):
        n_steps = -(-B // tb)
        pad = n_steps * tb - B
        key = (pad, -tb)
        if best_key is None or key < best_key:
            best_key, best_tb = key, tb
    return best_tb


def mnist_model_forward(x_nchw, prepped):
    """x_nchw: (B, 1, 28, 28). Returns (B, 10) f32 logits."""
    B = x_nchw.shape[0]
    # nn.Flatten + cast to bf16 (single fused pass; no K padding).
    x = x_nchw.reshape(B, K_IN).astype(jnp.bfloat16)       # (B, 784) bf16

    tb = _choose_batch_block(B)
    b_pad = pl.cdiv(B, tb) * tb
    if b_pad != B:
        x = jnp.pad(x, ((0, b_pad - B), (0, 0)))           # only pad when needed

    out = pl.pallas_call(
        mlp_kernel,
        out_shape=jax.ShapeDtypeStruct((b_pad, N_OUT_PAD), jnp.bfloat16),
        grid_spec=pltpu.PrefetchScalarGridSpec(
            num_scalar_prefetch=0,
            grid=(b_pad // tb,),
            in_specs=[
                pl.BlockSpec((tb, K_IN), lambda i: (i, 0)),        # x batch tile
                pl.BlockSpec((K_IN, N1), lambda i: (0, 0)),        # w1 (resident)
                pl.BlockSpec((N1, N2), lambda i: (0, 0)),          # w2 (resident)
                pl.BlockSpec((N2, N3), lambda i: (0, 0)),          # w3 (resident)
                pl.BlockSpec((N3, N_OUT_PAD), lambda i: (0, 0)),   # w4 (padded)
                pl.BlockSpec((1, BIAS_LEN), lambda i: (0, 0)),     # fused biases
            ],
            out_specs=pl.BlockSpec((tb, N_OUT_PAD), lambda i: (i, 0)),
        ),
        compiler_params=pltpu.CompilerParams(
            dimension_semantics=("parallel",)),
    )(x, prepped["w1"], prepped["w2"], prepped["w3"], prepped["w4"],
      prepped["bias"])

    return out[:B, :N_OUT].astype(jnp.float32)


# ----------------------------- parameter prep --------------------------------

def init_params(key):
    """Deterministic f32 params matching MNISTModel.__init__ shapes.

    Linear weights are stored (in, out); BN params as (1, N) rows.
    """
    ks = jax.random.split(key, 8)

    def linear(kw, kb, fan_in, fan_out):
        bound = 1.0 / jnp.sqrt(fan_in)
        w = jax.random.uniform(kw, (fan_in, fan_out), jnp.float32, -bound, bound)
        b = jax.random.uniform(kb, (1, fan_out), jnp.float32, -bound, bound)
        return w, b

    w1, b1 = linear(ks[0], ks[1], K_IN, N1)
    w2, b2 = linear(ks[2], ks[3], N1, N2)
    w3, b3 = linear(ks[4], ks[5], N2, N3)
    w4, b4 = linear(ks[6], ks[7], N3, N_OUT)

    def bn(n, k):
        kk = jax.random.split(k, 2)
        gamma = jnp.ones((1, n), jnp.float32)
        beta = jnp.zeros((1, n), jnp.float32)
        mean = 0.01 * jax.random.normal(kk[0], (1, n), jnp.float32)
        var = jnp.ones((1, n), jnp.float32) + 0.01 * jax.random.uniform(kk[1], (1, n))
        return gamma, beta, mean, var

    g1, be1, m1, v1 = bn(N1, jax.random.PRNGKey(1))
    g2, be2, m2, v2 = bn(N2, jax.random.PRNGKey(2))

    return dict(
        w1=w1, b1=b1, g1=g1, be1=be1, m1=m1, v1=v1,
        w2=w2, b2=b2, g2=g2, be2=be2, m2=m2, v2=v2,
        w3=w3, b3=b3, w4=w4, b4=b4,
    )


def prepare_params(p):
    """Host-side, one-time prep: fold BNs, pad final N dim, fuse biases, bf16 weights."""
    # Eval-mode BN affine: y = a*s + t
    s1 = p["g1"] / jnp.sqrt(p["v1"] + EPS)                  # (1, 512)
    t1 = p["be1"] - p["m1"] * s1
    s2 = p["g2"] / jnp.sqrt(p["v2"] + EPS)                  # (1, 256)
    t2 = p["be2"] - p["m2"] * s2

    # Layer 1: keep K = 784 (no padding; full-extent block in the kernel).
    w1 = p["w1"]                                            # (784, 512)
    b1 = p["b1"]                                            # (1, 512)

    # Fold BN1 into layer 2, BN2 into layer 3.
    w2 = s1.reshape(-1, 1) * p["w2"]                        # (512, 256)
    b2 = t1 @ p["w2"] + p["b2"]                             # (1, 256)
    w3 = s2.reshape(-1, 1) * p["w3"]                        # (256, 128)
    b3 = t2 @ p["w3"] + p["b3"]                             # (1, 128)

    # Layer 4: pad output dim 10 -> 128 with zero columns.
    w4 = jnp.pad(p["w4"], ((0, 0), (0, N_OUT_PAD - N_OUT))) # (128, 128)
    b4 = jnp.pad(p["b4"], ((0, 0), (0, N_OUT_PAD - N_OUT))) # (1, 128)

    bias = jnp.concatenate([b1, b2, b3, b4], axis=1)        # (1, 1024)

    return dict(
        w1=w1.astype(jnp.bfloat16),
        w2=w2.astype(jnp.bfloat16),
        w3=w3.astype(jnp.bfloat16),
        w4=w4.astype(jnp.bfloat16),
        bias=bias.astype(jnp.float32),
    )


# ------------------------------- references ----------------------------------

def reference_forward_f32(x_nchw, p):
    """Pure-JAX f32 reference of the original (unfolded) eval-mode MNISTModel."""
    x = x_nchw.reshape(x_nchw.shape[0], -1)
    h = jnp.maximum(x @ p["w1"] + p["b1"], 0.0)
    h = (h - p["m1"]) * (p["g1"] / jnp.sqrt(p["v1"] + EPS)) + p["be1"]
    h = jnp.maximum(h @ p["w2"] + p["b2"], 0.0)
    h = (h - p["m2"]) * (p["g2"] / jnp.sqrt(p["v2"] + EPS)) + p["be2"]
    h = jnp.maximum(h @ p["w3"] + p["b3"], 0.0)
    return h @ p["w4"] + p["b4"]


def reference_forward_matched(x_nchw, prepped):
    """Pure-JAX reference using the same folded/bf16 params & dtypes as the kernel."""
    B = x_nchw.shape[0]
    x = x_nchw.reshape(B, K_IN).astype(jnp.bfloat16)
    bias = prepped["bias"]
    b1 = bias[:, 0:N1]
    b2 = bias[:, N1:N1 + N2]
    b3 = bias[:, N1 + N2:N1 + N2 + N3]
    b4 = bias[:, N1 + N2 + N3:BIAS_LEN]
    h = jnp.dot(x, prepped["w1"], preferred_element_type=jnp.float32) + b1
    h = jnp.maximum(h, 0.0)
    h = jnp.dot(h.astype(jnp.bfloat16), prepped["w2"],
                preferred_element_type=jnp.float32) + b2
    h = jnp.maximum(h, 0.0)
    h = jnp.dot(h.astype(jnp.bfloat16), prepped["w3"],
                preferred_element_type=jnp.float32) + b3
    h = jnp.maximum(h, 0.0)
    out = jnp.dot(h.astype(jnp.bfloat16), prepped["w4"],
                  preferred_element_type=jnp.float32) + b4
    out = out.astype(jnp.bfloat16)
    return out[:, :N_OUT].astype(jnp.float32)


if __name__ == "__main__":
    key = jax.random.PRNGKey(0)
    kx, kp = jax.random.split(key)

    B = 8
    x = jax.random.normal(kx, (B, 1, 28, 28), jnp.float32)  # NCHW like PyTorch
    params = init_params(kp)
    prepped = prepare_params(params)

    out = jax.block_until_ready(mnist_model_forward(x, prepped))
    assert out.shape == (B, N_OUT)

    # Tight check vs. a JAX reference using the identical folded/bf16 params
    # (tolerance absorbs MXU vs XLA accumulation-order + final bf16 rounding).
    ref_matched = reference_forward_matched(x, prepped)
    assert jnp.allclose(out, ref_matched, atol=2e-3, rtol=2e-2), \
        "mismatch vs same-precision (folded/bf16) JAX reference"

    # Semantic sanity check vs. the original f32 eval-mode model
    # (looser tolerance absorbs bf16 weight/activation/output quantization).
    ref_f32 = reference_forward_f32(x, params)
    assert jnp.allclose(out, ref_f32, atol=3e-2, rtol=3e-2), \
        "mismatch vs original f32 eval-mode MNISTModel reference"

    print("KERNEL_OK")
</pallas_src>

<mosaic_0001>
module attributes {stable_mosaic.version = 11 : i64} {
  func.func @mlp_kernel(%arg0: i32, %arg1: memref<8x784xbf16, #tpu.memory_space<vmem>>, %arg2: memref<784x512xbf16, #tpu.memory_space<vmem>>, %arg3: memref<512x256xbf16, #tpu.memory_space<vmem>>, %arg4: memref<256x128xbf16, #tpu.memory_space<vmem>>, %arg5: memref<128x128xbf16, #tpu.memory_space<vmem>>, %arg6: memref<1x1024xf32, #tpu.memory_space<vmem>>, %arg7: memref<8x128xbf16, #tpu.memory_space<vmem>>) attributes {dimension_semantics = [#tpu.dimension_semantics<parallel>], iteration_bounds = array<i64: 1>, scalar_prefetch = 0 : i64, scratch_operands = 0 : i64, tpu.core_type = #tpu.core_type<tc>, window_params = [{transform_indices = @transform_0, window_bounds = array<i64: 8, 784>}, {pipeline_mode = #tpu.pipeline_mode<synchronous>, transform_indices = @transform_1, window_bounds = array<i64: 784, 512>}, {pipeline_mode = #tpu.pipeline_mode<synchronous>, transform_indices = @transform_2, window_bounds = array<i64: 512, 256>}, {pipeline_mode = #tpu.pipeline_mode<synchronous>, transform_indices = @transform_3, window_bounds = array<i64: 256, 128>}, {pipeline_mode = #tpu.pipeline_mode<synchronous>, transform_indices = @transform_4, window_bounds = array<i64: 128, 128>}, {pipeline_mode = #tpu.pipeline_mode<synchronous>, transform_indices = @transform_5, window_bounds = array<i64: 1, 1024>}, {transform_indices = @transform_6, window_bounds = array<i64: 8, 128>}]} {
    %c0 = arith.constant 0 : index
    %c0_0 = arith.constant 0 : index
    %0 = vector.load %arg6[%c0, %c0_0] : memref<1x1024xf32, #tpu.memory_space<vmem>>, vector<1x512xf32>
    %c0_1 = arith.constant 0 : index
    %c512 = arith.constant 512 : index
    %1 = vector.load %arg6[%c0_1, %c512] : memref<1x1024xf32, #tpu.memory_space<vmem>>, vector<1x256xf32>
    %c0_2 = arith.constant 0 : index
    %c768 = arith.constant 768 : index
    %2 = vector.load %arg6[%c0_2, %c768] : memref<1x1024xf32, #tpu.memory_space<vmem>>, vector<1x128xf32>
    %c0_3 = arith.constant 0 : index
    %c896 = arith.constant 896 : index
    %3 = vector.load %arg6[%c0_3, %c896] : memref<1x1024xf32, #tpu.memory_space<vmem>>, vector<1x128xf32>
    %c0_4 = arith.constant 0 : index
    %c0_5 = arith.constant 0 : index
    %4 = vector.load %arg1[%c0_4, %c0_5] : memref<8x784xbf16, #tpu.memory_space<vmem>>, vector<8x784xbf16>
    %c0_6 = arith.constant 0 : index
    %c0_7 = arith.constant 0 : index
    %5 = vector.load %arg2[%c0_6, %c0_7] : memref<784x512xbf16, #tpu.memory_space<vmem>>, vector<784x512xbf16>
    %cst = arith.constant dense<0.000000e+00> : vector<8x512xf32>
    %6 = tpu.matmul %4, %5, %cst {dimension_numbers = #tpu.dot_dimension_numbers<[1], [0], [0], [1], [0, 0, 1, 1], [], []>} : vector<8x784xbf16>, vector<784x512xbf16>, vector<8x512xf32> -> vector<8x512xf32>
    %7 = vector.broadcast %0 : vector<1x512xf32> to vector<8x512xf32>
    %8 = arith.addf %6, %7 : vector<8x512xf32>
    %cst_8 = arith.constant 0.000000e+00 : f32
    %9 = vector.broadcast %cst_8 : f32 to vector<8x512xf32>
    %10 = arith.maximumf %8, %9 : vector<8x512xf32>
    %11 = arith.truncf %10 : vector<8x512xf32> to vector<8x512xbf16>
    %c0_9 = arith.constant 0 : index
    %c0_10 = arith.constant 0 : index
    %12 = vector.load %arg3[%c0_9, %c0_10] : memref<512x256xbf16, #tpu.memory_space<vmem>>, vector<512x256xbf16>
    %cst_11 = arith.constant dense<0.000000e+00> : vector<8x256xf32>
    %13 = tpu.matmul %11, %12, %cst_11 {dimension_numbers = #tpu.dot_dimension_numbers<[1], [0], [0], [1], [0, 0, 1, 1], [], []>} : vector<8x512xbf16>, vector<512x256xbf16>, vector<8x256xf32> -> vector<8x256xf32>
    %14 = vector.broadcast %1 : vector<1x256xf32> to vector<8x256xf32>
    %15 = arith.addf %13, %14 : vector<8x256xf32>
    %cst_12 = arith.constant 0.000000e+00 : f32
    %16 = vector.broadcast %cst_12 : f32 to vector<8x256xf32>
    %17 = arith.maximumf %15, %16 : vector<8x256xf32>
    %18 = arith.truncf %17 : vector<8x256xf32> to vector<8x256xbf16>
    %c0_13 = arith.constant 0 : index
    %c0_14 = arith.constant 0 : index
    %19 = vector.load %arg4[%c0_13, %c0_14] : memref<256x128xbf16, #tpu.memory_space<vmem>>, vector<256x128xbf16>
    %cst_15 = arith.constant dense<0.000000e+00> : vector<8x128xf32>
    %20 = tpu.matmul %18, %19, %cst_15 {dimension_numbers = #tpu.dot_dimension_numbers<[1], [0], [0], [1], [0, 0, 1, 1], [], []>} : vector<8x256xbf16>, vector<256x128xbf16>, vector<8x128xf32> -> vector<8x128xf32>
    %21 = vector.broadcast %2 : vector<1x128xf32> to vector<8x128xf32>
    %22 = arith.addf %20, %21 : vector<8x128xf32>
    %cst_16 = arith.constant 0.000000e+00 : f32
    %23 = vector.broadcast %cst_16 : f32 to vector<8x128xf32>
    %24 = arith.maximumf %22, %23 : vector<8x128xf32>
    %25 = arith.truncf %24 : vector<8x128xf32> to vector<8x128xbf16>
    %c0_17 = arith.constant 0 : index
    %c0_18 = arith.constant 0 : index
    %26 = vector.load %arg5[%c0_17, %c0_18] : memref<128x128xbf16, #tpu.memory_space<vmem>>, vector<128x128xbf16>
    %cst_19 = arith.constant dense<0.000000e+00> : vector<8x128xf32>
    %27 = tpu.matmul %25, %26, %cst_19 {dimension_numbers = #tpu.dot_dimension_numbers<[1], [0], [0], [1], [0, 0, 1, 1], [], []>} : vector<8x128xbf16>, vector<128x128xbf16>, vector<8x128xf32> -> vector<8x128xf32>
    %28 = vector.broadcast %3 : vector<1x128xf32> to vector<8x128xf32>
    %29 = arith.addf %27, %28 : vector<8x128xf32>
    %30 = arith.truncf %29 : vector<8x128xf32> to vector<8x128xbf16>
    %c0_20 = arith.constant 0 : index
    %c0_21 = arith.constant 0 : index
    %31 = vector.load %arg7[%c0_20, %c0_21] : memref<8x128xbf16, #tpu.memory_space<vmem>>, vector<8x128xbf16>
    tpu.vector_store %arg7[%c0_20, %c0_21], %30 {strides = array<i32>} : memref<8x128xbf16, #tpu.memory_space<vmem>>, vector<8x128xbf16>,
    return
  }
  func.func @transform_0(%arg0: i32) -> (i32, i32) {
    %c0_i32 = arith.constant 0 : i32
    %c0_i32_0 = arith.constant 0 : i32
    return %arg0, %c0_i32 : i32, i32
  }
  func.func @transform_1(%arg0: i32) -> (i32, i32) {
    %c0_i32 = arith.constant 0 : i32
    %c0_i32_0 = arith.constant 0 : i32
    %c0_i32_1 = arith.constant 0 : i32
    return %c0_i32, %c0_i32_0 : i32, i32
  }
  func.func @transform_2(%arg0: i32) -> (i32, i32) {
    %c0_i32 = arith.constant 0 : i32
    %c0_i32_0 = arith.constant 0 : i32
    %c0_i32_1 = arith.constant 0 : i32
    return %c0_i32, %c0_i32_0 : i32, i32
  }
  func.func @transform_3(%arg0: i32) -> (i32, i32) {
    %c0_i32 = arith.constant 0 : i32
    %c0_i32_0 = arith.constant 0 : i32
    %c0_i32_1 = arith.constant 0 : i32
    return %c0_i32, %c0_i32_0 : i32, i32
  }
  func.func @transform_4(%arg0: i32) -> (i32, i32) {
    %c0_i32 = arith.constant 0 : i32
    %c0_i32_0 = arith.constant 0 : i32
    %c0_i32_1 = arith.constant 0 : i32
    return %c0_i32, %c0_i32_0 : i32, i32
  }
  func.func @transform_5(%arg0: i32) -> (i32, i32) {
    %c0_i32 = arith.constant 0 : i32
    %c0_i32_0 = arith.constant 0 : i32
    %c0_i32_1 = arith.constant 0 : i32
    return %c0_i32, %c0_i32_0 : i32, i32
  }
  func.func @transform_6(%arg0: i32) -> (i32, i32) {
    %c0_i32 = arith.constant 0 : i32
    %c0_i32_0 = arith.constant 0 : i32
    return %arg0, %c0_i32 : i32, i32
  }
}

</mosaic_0001>

<bundles_post_ra>
// kernel: tpu_custom_call.1
= control target key start
LH: loop header
LB: loop body
LE: loop exit
PB: predicated region body
PF: predicated region fallthrough
CT: control target
= control target key end

     0   :  { %11 = vsyncpa [#allocation3], 0  ;;  %s3590_s0 = inlined_call_operand.hbm [shape: bf16[8,784], index: 0, kind: input, shape index: {}]   ;;  %s3591_s1 = inlined_call_operand.hbm [shape: bf16[784,512], index: 1, kind: input, shape index: {}]   ;;  %s3592_s2 = inlined_call_operand.hbm [shape: bf16[512,256], index: 2, kind: input, shape index: {}]   ;;  %s3593_s3 = inlined_call_operand.hbm [shape: bf16[256,128], index: 3, kind: input, shape index: {}]   ;;  %s3594_s4 = inlined_call_operand.hbm [shape: bf16[128,128], index: 4, kind: input, shape index: {}]   ;;  %s3595_s5 = inlined_call_operand.vmem [shape: f32[1,1024], index: 5, kind: input, shape index: {}]   ;;  %s3596_s6 = inlined_call_operand.hbm [shape: bf16[8,128], index: 6, kind: output, shape index: {}]  }
   0x1   :  { %12 = vsyncpa [#allocation6], 0 }
   0x2   :  { %13 = vsyncpa [#allocation9], 0 }
   0x3   :  { %14 = vsyncpa [#allocation4], 0  ;;  %s3401_s21 = smov [#allocation5]   ;;  %s3261_s25 = scalar_lea.hbm %s3591_s1, 25088 }
   0x4   :  { %s30_s22 = sshll.u32 %s3401_s21, 4  ;;  %p3262_p0 = scmp.ne.s32.totalorder %s3591_s1, %s3261_s25  ;;  %s31_s22 = int_to_ptr.vmem [resolvable:$true] %s30_s22 }
   0x5   :  { %p3265_p1 = scmp.lt.u32.totalorder %s3261_s25, %s3591_s1 }
   0x7   :  { %p3267_p2 = pnand %p3265_p1, %p3262_p0 }
   0x9   :  { %3270 = shalt.err (!%p3267_p2)
}
   0xa   :  { %s3271_s30 = scalar_lea.vmem %s31_s22, 25088  ;;  %p3276_p4 = scmp.lt.s32.totalorder %s31_s22, %s31_s22 }
   0xb   :  { %p3272_p3 = scmp.ne.s32.totalorder %s31_s22, %s3271_s30  ;;  %p3277_p5 = scmp.lt.s32.totalorder %s3271_s30, %s3271_s30 }
   0xd   :  { %p3278_p6 = por %p3277_p5, %p3276_p4 }
   0xf   :  { %p3279_p7 = pnand %p3278_p6, %p3272_p3 }
  0x11   :  { %3282 = shalt.err (!%p3279_p7)
}
  0x12   :  { %s3402_s7 = smov 256   ;;  %s3403_s8 = smov 16  }
  0x13   :  { %36 = dma.hbm_to_vmem [thread:$0]  %s3591_s1, 25088, %s31_s22, [#allocation6], %s3402_s7, %s3402_s7, %s3403_s8  }
  0x14   :  { %s3404_s11 = smov [#allocation8]   ;;  %s3283_s15 = scalar_lea.hbm %s3593_s3, 2048 }
  0x15   :  { %s54_s12 = sshll.u32 %s3404_s11, 4  ;;  %p3284_p8 = scmp.ne.s32.totalorder %s3593_s3, %s3283_s15  ;;  %s55_s12 = int_to_ptr.vmem [resolvable:$true] %s54_s12 }
  0x16   :  { %p3287_p9 = scmp.lt.u32.totalorder %s3283_s15, %s3593_s3 }
  0x18   :  { %p3289_p10 = pnand %p3287_p9, %p3284_p8 }
  0x1a   :  { %3292 = shalt.err (!%p3289_p10)
}
  0x1b   :  { %s3293_s20 = scalar_lea.vmem %s55_s12, 2048  ;;  %p3298_p12 = scmp.lt.s32.totalorder %s55_s12, %s55_s12 }
  0x1c   :  { %p3294_p11 = scmp.ne.s32.totalorder %s55_s12, %s3293_s20  ;;  %p3299_p13 = scmp.lt.s32.totalorder %s3293_s20, %s3293_s20 }
  0x1e   :  { %p3300_p0 = por %p3299_p13, %p3298_p12 }
  0x20   :  { %p3301_p1 = pnand %p3300_p0, %p3294_p11 }
  0x22   :  { %3304 = shalt.err (!%p3301_p1)
}
  0x23   :  { %s3405_s1 = smov 64   ;;  %s3406_s21 = smov 4  }
  0x24   :  { %60 = dma.hbm_to_vmem [thread:$0]  %s3593_s3, 2048, %s55_s12, [#allocation9], %s3405_s1, %s3405_s1, %s3406_s21  }
  0x25   :  { %s3407_s24 = smov [#allocation2]   ;;  %s3408_s26 = smov [#allocation7]  }
  0x26   :  { %s21_s25 = sshll.u32 %s3407_s24, 4  ;;  %s42_s27 = sshll.u32 %s3408_s26, 4  ;;  %s22_s25 = int_to_ptr.vmem [resolvable:$true] %s21_s25  ;;  %s3478_s27 = int_to_ptr.vmem [resolvable:$true] %s42_s27 }
  0x27   :  { %s3305_s30 = scalar_lea.hbm %s3590_s0, 448 }
  0x28   :  { %p3306_p2 = scmp.ne.s32.totalorder %s3590_s0, %s3305_s30  ;;  %p3309_p3 = scmp.lt.u32.totalorder %s3305_s30, %s3590_s0 }
  0x2a   :  { %p3311_p4 = pnand %p3309_p3, %p3306_p2 }
  0x2c   :  { %3314 = shalt.err (!%p3311_p4)
}
  0x2d   :  { %s3315_s3 = scalar_lea.vmem %s22_s25, 448  ;;  %p3320_p6 = scmp.lt.s32.totalorder %s22_s25, %s22_s25 }
  0x2e   :  { %p3316_p5 = scmp.ne.s32.totalorder %s22_s25, %s3315_s3  ;;  %p3321_p7 = scmp.lt.s32.totalorder %s3315_s3, %s3315_s3 }
  0x30   :  { %p3322_p8 = por %p3321_p7, %p3320_p6 }
  0x32   :  { %p3323_p9 = pnand %p3322_p8, %p3316_p5 }
  0x34   :  { %3326 = shalt.err (!%p3323_p9)
}
  0x35   :  { %24 = dma.hbm_to_vmem [thread:$0]  %s3590_s0, 448, %s22_s25, [#allocation3]  }
  0x36   :  { %s3327_s15 = scalar_lea.hbm %s3592_s2, 8192 }
  0x37   :  { %p3328_p10 = scmp.ne.s32.totalorder %s3592_s2, %s3327_s15  ;;  %p3331_p11 = scmp.lt.u32.totalorder %s3327_s15, %s3592_s2 }
  0x39   :  { %p3333_p12 = pnand %p3331_p11, %p3328_p10 }
  0x3b   :  { %3336 = shalt.err (!%p3333_p12)
}
  0x3c   :  { %s3337_s20 = scalar_lea.vmem %s3478_s27, 8192  ;;  %p3342_p0 = scmp.lt.s32.totalorder %s3478_s27, %s3478_s27 }
  0x3d   :  { %p3338_p13 = scmp.ne.s32.totalorder %s3478_s27, %s3337_s20  ;;  %p3343_p1 = scmp.lt.s32.totalorder %s3337_s20, %s3337_s20 }
  0x3f   :  { %p3344_p2 = por %p3343_p1, %p3342_p0 }
  0x41   :  { %p3345_p3 = pnand %p3344_p2, %p3338_p13 }
  0x43   :  { %3348 = shalt.err (!%p3345_p3)
}
  0x44   :  { %s3409_s0 = smov 128   ;;  %s3410_s22 = smov 8  }
  0x45   :  { %48 = dma.hbm_to_vmem [thread:$0]  %s3592_s2, 8192, %s3478_s27, [#allocation6], %s3409_s0, %s3409_s0, %s3410_s22  }
  0x46   :  { %s3411_s25 = smov [#allocation10]   ;;  %s3349_s30 = scalar_lea.hbm %s3594_s4, 1024 }
  0x47   :  { %s66_s26 = sshll.u32 %s3411_s25, 4  ;;  %p3350_p4 = scmp.ne.s32.totalorder %s3594_s4, %s3349_s30  ;;  %s67_s26 = int_to_ptr.vmem [resolvable:$true] %s66_s26 }
  0x48   :  { %p3353_p5 = scmp.lt.u32.totalorder %s3349_s30, %s3594_s4 }
  0x4a   :  { %p3355_p6 = pnand %p3353_p5, %p3350_p4 }
  0x4c   :  { %3358 = shalt.err (!%p3355_p6)
}
  0x4d   :  { %s3359_s3 = scalar_lea.vmem %s67_s26, 1024  ;;  %p3364_p8 = scmp.lt.s32.totalorder %s67_s26, %s67_s26 }
  0x4e   :  { %p3360_p7 = scmp.ne.s32.totalorder %s67_s26, %s3359_s3  ;;  %p3365_p9 = scmp.lt.s32.totalorder %s3359_s3, %s3359_s3 }
  0x50   :  { %p3366_p10 = por %p3365_p9, %p3364_p8 }
  0x52   :  { %p3367_p11 = pnand %p3366_p10, %p3360_p7 }
  0x54   :  { %3370 = shalt.err (!%p3367_p11)
}
  0x55   :  { %72 = dma.hbm_to_vmem [thread:$0]  %s3594_s4, 1024, %s67_s26, [#allocation9], %s3405_s1, %s3405_s1, %s3406_s21  }
  0x56   :  { %3393 = dma.done.wait [#allocation3], 448  }
  0x57   :  { %3394 = vsyncadd [#allocation3], 4294966848 }
  0x58   :  { %3395 = dma.done.wait [#allocation6], 33280  }
  0x59   :  { %3396 = vsyncadd [#allocation6], 4294934016 }
  0x5a   :  { %3397 = dma.done.wait [#allocation9], 3072  }
  0x5b   :  { %3398 = vsyncadd [#allocation9], 4294964224  ;;  %v3412_v0 = vmov 0   ;;  %v2839_v1 = vld [vmem:[#allocation5 + $0x4] ss:$16 sps:$4 sm:$0xff]   ;;  %vm1320_vm0 = vcmask 130048  }
  0x5c   :  { %1479 = vmatprep.mubr.bf16.mxu1 %v3412_v0  ;;  %v2841_v2 = vld [vmem:[#allocation5 + $0x604] ss:$16 sps:$4 sm:$0xff]   ;;  %1324 = vmatprep.subr.bf16.mxu0 %v2839_v1  ;;  %v2843_v3 = vld [vmem:[#allocation5] ss:$16 sps:$4 sm:$0xff]   ;;  %v2847_v6 = vld [vmem:[#allocation5 + $0x8] ss:$16 sps:$4 sm:$0xff]  }
  0x5d   :  { %v2844_v4 = vld [vmem:[#allocation5 + $0x600] ss:$16 sps:$4 sm:$0xff]   ;;  %1447 = vmatprep.subr.bf16.mxu1 %v2841_v2  ;;  %v2845_v5 = vld [vmem:[#allocation5 + $0x24] ss:$16 sps:$4 sm:$0xff]   ;;  %1325 = vmatpush1.bf16.msra.mxu0 %v2843_v3  ;;  %v2849_v7 = vld [vmem:[#allocation5 + $0xc] ss:$16 sps:$4 sm:$0xff]  }
  0x5e   :  { %1448 = vmatpush1.bf16.msra.mxu1 %v2844_v4  ;;  %1326 = vmatprep.subr.bf16.mxu0 %v2845_v5  ;;  %v2850_v8 = vld [vmem:[#allocation5 + $0x20] ss:$16 sps:$4 sm:$0xff]   ;;  %v2851_v9 = vld [vmem:[#allocation2 + $0x18] ss:$0 sps:$4 sm:$0xff]   ;;  %v2852_v10 = vld [vmem:[#allocation5 + $0x44] ss:$16 sps:$4 sm:$0xff]  }
  0x5f   :  { %1488 = vmatprep.subr.bf16.mxu1 %v2849_v7  ;;  %v2854_v11 = vld [vmem:[#allocation5 + $0x28] ss:$16 sps:$4 sm:$0xff]   ;;  %v2856_v12 = vld [vmem:[#allocation5 + $0x2c] ss:$16 sps:$4 sm:$0xff]   ;;  %v2857_v13 = vld [vmem:[#allocation5 + $0x40] ss:$16 sps:$4 sm:$0xff]  }
  0x60   :  { %v2858_v14 = vld [vmem:[#allocation5 + $0x64] ss:$16 sps:$4 sm:$0xff]   ;;  %v2862_v15 = vld [vmem:[#allocation5 + $0x4c] ss:$16 sps:$4 sm:$0xff]   ;;  %v2860_v16 = vld [vmem:[#allocation5 + $0x48] ss:$16 sps:$4 sm:$0xff]  }
  0x61   :  { %2649 = vmatmul.mubr.msk.bf16.vlgmr.msra.gmra.mrb[0].mxu1 %vm1320_vm0, %v2851_v9  ;;  %1327 = vmatpush1.bf16.msra.mxu0 %v2850_v8  ;;  %v2863_v17 = vld [vmem:[#allocation5 + $0x60] ss:$16 sps:$4 sm:$0xff]   ;;  %v2864_v18 = vld [vmem:[#allocation5 + $0x84] ss:$16 sps:$4 sm:$0xff]   ;;  %v2868_v19 = vld [vmem:[#allocation5 + $0x6c] ss:$16 sps:$4 sm:$0xff]  }
  0x62   :  { %1489 = vmatpush1.bf16.msra.mxu1 %v2847_v6  ;;  %1328 = vmatprep.subr.bf16.mxu0 %v2852_v10  ;;  %v2866_v20 = vld [vmem:[#allocation5 + $0x68] ss:$16 sps:$4 sm:$0xff]   ;;  %v2869_v21 = vld [vmem:[#allocation5 + $0x80] ss:$16 sps:$4 sm:$0xff]   ;;  %v2870_v22 = vld [vmem:[#allocation5 + $0xa4] ss:$16 sps:$4 sm:$0xff]  }
  0x63   :  { %1490 = vmatprep.subr.bf16.mxu1 %v2856_v12  ;;  %v2874_v23 = vld [vmem:[#allocation5 + $0x8c] ss:$16 sps:$4 sm:$0xff]   ;;  %v2872_v24 = vld [vmem:[#allocation5 + $0x88] ss:$16 sps:$4 sm:$0xff]   ;;  %v2875_v25 = vld [vmem:[#allocation5 + $0xa0] ss:$16 sps:$4 sm:$0xff]  }
  0x64   :  { %v2876_v26 = vld [vmem:[#allocation5 + $0xc4] ss:$16 sps:$4 sm:$0xff]   ;;  %v2880_v27 = vld [vmem:[#allocation5 + $0xac] ss:$16 sps:$4 sm:$0xff]   ;;  %v2878_v28 = vld [vmem:[#allocation5 + $0xa8] ss:$16 sps:$4 sm:$0xff]  }
  0x65   :  { %1329 = vmatpush1.bf16.msra.mxu0 %v2857_v13  ;;  %v2881_v29 = vld [vmem:[#allocation5 + $0xc0] ss:$16 sps:$4 sm:$0xff]   ;;  %v2882_v30 = vld [vmem:[#allocation5 + $0xe4] ss:$16 sps:$4 sm:$0xff]   ;;  %v2886_v31 = vld [vmem:[#allocation5 + $0xcc] ss:$16 sps:$4 sm:$0xff]  }
  0x66   :  { %1491 = vmatpush1.bf16.msra.mxu1 %v2854_v11  ;;  %1330 = vmatprep.subr.bf16.mxu0 %v2858_v14  ;;  %v2884_v32 = vld [vmem:[#allocation5 + $0xc8] ss:$16 sps:$4 sm:$0xff]   ;;  %v2887_v33 = vld [vmem:[#allocation5 + $0xe0] ss:$16 sps:$4 sm:$0xff]   ;;  %v2888_v34 = vld [vmem:[#allocation5 + $0x104] ss:$16 sps:$4 sm:$0xff]  }
  0x67   :  { %1492 = vmatprep.subr.bf16.mxu1 %v2862_v15  ;;  %v2892_v35 = vld [vmem:[#allocation5 + $0xec] ss:$16 sps:$4 sm:$0xff]   ;;  %v2890_v36 = vld [vmem:[#allocation5 + $0xe8] ss:$16 sps:$4 sm:$0xff]   ;;  %v2893_v37 = vld [vmem:[#allocation5 + $0x100] ss:$16 sps:$4 sm:$0xff]  }
  0x68   :  { %v2894_v38 = vld [vmem:[#allocation5 + $0x124] ss:$16 sps:$4 sm:$0xff]   ;;  %v2898_v39 = vld [vmem:[#allocation5 + $0x10c] ss:$16 sps:$4 sm:$0xff]   ;;  %v2896_v40 = vld [vmem:[#allocation5 + $0x108] ss:$16 sps:$4 sm:$0xff]  }
  0x69   :  { %1331 = vmatpush1.bf16.msra.mxu0 %v2863_v17  ;;  %v2899_v41 = vld [vmem:[#allocation5 + $0x120] ss:$16 sps:$4 sm:$0xff]   ;;  %v2900_v42 = vld [vmem:[#allocation5 + $0x144] ss:$16 sps:$4 sm:$0xff]   ;;  %v2904_v43 = vld [vmem:[#allocation5 + $0x12c] ss:$16 sps:$4 sm:$0xff]  }
  0x6a   :  { %1493 = vmatpush1.bf16.msra.mxu1 %v2860_v16  ;;  %1332 = vmatprep.subr.bf16.mxu0 %v2864_v18  ;;  %v2902_v44 = vld [vmem:[#allocation5 + $0x128] ss:$16 sps:$4 sm:$0xff]   ;;  %v2905_v45 = vld [vmem:[#allocation5 + $0x140] ss:$16 sps:$4 sm:$0xff]   ;;  %v2906_v46 = vld [vmem:[#allocation5 + $0x164] ss:$16 sps:$4 sm:$0xff]  }
  0x6b   :  { %1494 = vmatprep.subr.bf16.mxu1 %v2868_v19  ;;  %v2910_v47 = vld [vmem:[#allocation5 + $0x14c] ss:$16 sps:$4 sm:$0xff]   ;;  %v2908_v48 = vld [vmem:[#allocation5 + $0x148] ss:$16 sps:$4 sm:$0xff]   ;;  %v2911_v50 = vld [vmem:[#allocation5 + $0x160] ss:$16 sps:$4 sm:$0xff]  }
  0x6c   :  { %v95_v49 = vld [vmem:[#allocation2] sm:$0xff]  ;;  %v2916_v53 = vld [vmem:[#allocation5 + $0x16c] ss:$16 sps:$4 sm:$0xff]   ;;  %v2917_v55 = vld [vmem:[#allocation5 + $0x180] ss:$16 sps:$4 sm:$0xff]   ;;  %vm3414_vm1 = vmmov 0  }
  0x6d   :  { %1333 = vmatpush1.bf16.msra.mxu0 %v2869_v21  ;;  %v2912_v51 = vld [vmem:[#allocation5 + $0x184] ss:$16 sps:$4 sm:$0xff]   ;;  %v2447_v52 = vcombine.high %v95_v49, %v95_v49  ;;  %v2914_v54 = vld [vmem:[#allocation5 + $0x168] ss:$16 sps:$4 sm:$0xff]   ;;  %v2922_v57 = vld [vmem:[#allocation5 + $0x18c] ss:$16 sps:$4 sm:$0xff]   ;;  %v2446_v7 = vcombine.low %v95_v49, %v95_v49 }
  0x6e   :  { %1495 = vmatpush1.bf16.msra.mxu1 %v2866_v20  ;;  %1334 = vmatprep.subr.bf16.mxu0 %v2870_v22  ;;  %v2918_v56 = vld [vmem:[#allocation5 + $0x1a4] ss:$16 sps:$4 sm:$0xff]   ;;  %v2920_v58 = vld [vmem:[#allocation5 + $0x188] ss:$16 sps:$4 sm:$0xff]   ;;  %v2923_v59 = vld [vmem:[#allocation5 + $0x1a0] ss:$16 sps:$4 sm:$0xff]  }
  0x6f   :  { %1496 = vmatprep.subr.bf16.mxu1 %v2874_v23  ;;  %1356 = vmatprep.mubr.bf16.mxu0 %v2447_v52  ;;  %v2924_v60 = vld [vmem:[#allocation5 + $0x1c4] ss:$16 sps:$4 sm:$0xff]   ;;  %v2928_v61 = vld [vmem:[#allocation5 + $0x1ac] ss:$16 sps:$4 sm:$0xff]   ;;  %v2926_v62 = vld [vmem:[#allocation5 + $0x1a8] ss:$16 sps:$4 sm:$0xff]  }
  0x70   :  { %1520 = vmatprep.mubr.bf16.mxu1 %v2447_v52  ;;  %v2929_v63 = vld [vmem:[#allocation5 + $0x1c0] ss:$16 sps:$4 sm:$0xff]   ;;  %v2930_v1 = vld [vmem:[#allocation5 + $0x1e4] ss:$16 sps:$4 sm:$0xff]   ;;  %v2934_v2 = vld [vmem:[#allocation5 + $0x1cc] ss:$16 sps:$4 sm:$0xff]  }
  0x71   :  { %1335 = vmatpush1.bf16.msra.mxu0 %v2875_v25  ;;  %v2932_v3 = vld [vmem:[#allocation5 + $0x1c8] ss:$16 sps:$4 sm:$0xff]   ;;  %v2935_v4 = vld [vmem:[#allocation5 + $0x1e0] ss:$16 sps:$4 sm:$0xff]   ;;  %v2940_v5 = vld [vmem:[#allocation5 + $0x204] ss:$16 sps:$4 sm:$0xff]  }
  0x72   :  { %1497 = vmatpush1.bf16.msra.mxu1 %v2872_v24  ;;  %1336 = vmatprep.subr.bf16.mxu0 %v2876_v26  ;;  %v2943_v6 = vld [vmem:[#allocation5 + $0x1ec] ss:$16 sps:$4 sm:$0xff]   ;;  %v2938_v8 = vld [vmem:[#allocation5 + $0x200] ss:$16 sps:$4 sm:$0xff]   ;;  %v2941_v9 = vld [vmem:[#allocation5 + $0x1e8] ss:$16 sps:$4 sm:$0xff]  }
  0x73   :  { %1498 = vmatprep.subr.bf16.mxu1 %v2880_v27  ;;  %v2946_v10 = vld [vmem:[#allocation5 + $0x224] ss:$16 sps:$4 sm:$0xff]   ;;  %v2949_v11 = vld [vmem:[#allocation5 + $0x20c] ss:$16 sps:$4 sm:$0xff]   ;;  %v2944_v12 = vld [vmem:[#allocation5 + $0x220] ss:$16 sps:$4 sm:$0xff]  }
  0x74   :  { %v2947_v13 = vld [vmem:[#allocation5 + $0x208] ss:$16 sps:$4 sm:$0xff]   ;;  %v2952_v14 = vld [vmem:[#allocation5 + $0x244] ss:$16 sps:$4 sm:$0xff]   ;;  %v2955_v15 = vld [vmem:[#allocation5 + $0x22c] ss:$16 sps:$4 sm:$0xff]  }
  0x75   :  { %1337 = vmatpush1.bf16.msra.mxu0 %v2881_v29  ;;  %v2950_v16 = vld [vmem:[#allocation5 + $0x240] ss:$16 sps:$4 sm:$0xff]   ;;  %v2953_v17 = vld [vmem:[#allocation5 + $0x228] ss:$16 sps:$4 sm:$0xff]   ;;  %v2958_v18 = vld [vmem:[#allocation5 + $0x264] ss:$16 sps:$4 sm:$0xff]  }
  0x76   :  { %1499 = vmatpush1.bf16.msra.mxu1 %v2878_v28  ;;  %1338 = vmatprep.subr.bf16.mxu0 %v2882_v30  ;;  %v2961_v19 = vld [vmem:[#allocation5 + $0x24c] ss:$16 sps:$4 sm:$0xff]   ;;  %v2956_v20 = vld [vmem:[#allocation5 + $0x260] ss:$16 sps:$4 sm:$0xff]   ;;  %v2959_v21 = vld [vmem:[#allocation5 + $0x248] ss:$16 sps:$4 sm:$0xff]  }
  0x77   :  { %1500 = vmatprep.subr.bf16.mxu1 %v2886_v31  ;;  %v2964_v22 = vld [vmem:[#allocation5 + $0x284] ss:$16 sps:$4 sm:$0xff]   ;;  %v2967_v23 = vld [vmem:[#allocation5 + $0x26c] ss:$16 sps:$4 sm:$0xff]   ;;  %v2962_v24 = vld [vmem:[#allocation5 + $0x280] ss:$16 sps:$4 sm:$0xff]  }
  0x78   :  { %v2965_v25 = vld [vmem:[#allocation5 + $0x268] ss:$16 sps:$4 sm:$0xff]   ;;  %v2970_v26 = vld [vmem:[#allocation5 + $0x2a4] ss:$16 sps:$4 sm:$0xff]   ;;  %v2973_v27 = vld [vmem:[#allocation5 + $0x28c] ss:$16 sps:$4 sm:$0xff]  }
  0x79   :  { %1339 = vmatpush1.bf16.msra.mxu0 %v2887_v33  ;;  %v2968_v28 = vld [vmem:[#allocation5 + $0x2a0] ss:$16 sps:$4 sm:$0xff]   ;;  %v2971_v29 = vld [vmem:[#allocation5 + $0x288] ss:$16 sps:$4 sm:$0xff]   ;;  %v2976_v30 = vld [vmem:[#allocation5 + $0x2c4] ss:$16 sps:$4 sm:$0xff]  }
  0x7a   :  { %1501 = vmatpush1.bf16.msra.mxu1 %v2884_v32  ;;  %1340 = vmatprep.subr.bf16.mxu0 %v2888_v34  ;;  %v2979_v31 = vld [vmem:[#allocation5 + $0x2ac] ss:$16 sps:$4 sm:$0xff]   ;;  %v2974_v33 = vld [vmem:[#allocation5 + $0x2c0] ss:$16 sps:$4 sm:$0xff]   ;;  %v2977_v34 = vld [vmem:[#allocation5 + $0x2a8] ss:$16 sps:$4 sm:$0xff]  }
  0x7b   :  { %1502 = vmatprep.subr.bf16.mxu1 %v2892_v35  ;;  %v3526_v32 = vld [vmem:[#allocation2 + $0x8] sm:$0xff]  ;;  %v3006_v52 = vld [vmem:[#allocation5 + $0x364] ss:$16 sps:$4 sm:$0xff]   ;;  %s3415_s16 = smov [#allocation11]  }
  0x7c   :  { %v2449_v35 = vcombine.high %v3526_v32, %v3526_v32  ;;  %v3003_v49 = vld [vmem:[#allocation5 + $0x32c] ss:$16 sps:$4 sm:$0xff]   ;;  %s2435_s17 = sshll.u32 %s3415_s16, 4  ;;  %s2436_s17 = int_to_ptr.vmem [resolvable:$true] %s2435_s17 }
  0x7d   :  { %1341 = vmatpush1.bf16.msra.mxu0 %v2893_v37  ;;  %v2985_v37 = vld [vmem:[#allocation5 + $0x2cc] ss:$16 sps:$4 sm:$0xff]   ;;  %s3371_s18 = scalar_lea.vmem %s2436_s17, 64  ;;  %p3376_p13 = scmp.lt.s32.totalorder %s2436_s17, %s2436_s17 }
  0x7e   :  { %1503 = vmatpush1.bf16.msra.mxu1 %v2890_v36  ;;  %1342 = vmatprep.subr.bf16.mxu0 %v2894_v38  ;;  %v2982_v36 = vld [vmem:[#allocation5 + $0x2e4] ss:$16 sps:$4 sm:$0xff]   ;;  %v2980_v38 = vld [vmem:[#allocation5 + $0x2e0] ss:$16 sps:$4 sm:$0xff]   ;;  %p3372_p12 = scmp.ne.s32.totalorder %s2436_s17, %s3371_s18  ;;  %p3377_p0 = scmp.lt.s32.totalorder %s3371_s18, %s3371_s18 }
  0x7f   :  { %1504 = vmatprep.subr.bf16.mxu1 %v2898_v39  ;;  %v2983_v39 = vld [vmem:[#allocation5 + $0x2c8] ss:$16 sps:$4 sm:$0xff]  }
  0x80   :  { %p3378_p1 = por %p3377_p0, %p3376_p13 }
  0x81   :  { %1343 = vmatpush1.bf16.msra.mxu0 %v2899_v41  ;;  %v2991_v41 = vld [vmem:[#allocation5 + $0x2ec] ss:$16 sps:$4 sm:$0xff]  }
  0x82   :  { %1505 = vmatpush1.bf16.msra.mxu1 %v2896_v40  ;;  %1344 = vmatprep.subr.bf16.mxu0 %v2900_v42  ;;  %v2988_v40 = vld [vmem:[#allocation5 + $0x304] ss:$16 sps:$4 sm:$0xff]   ;;  %v2986_v42 = vld [vmem:[#allocation5 + $0x300] ss:$16 sps:$4 sm:$0xff]   ;;  %p3379_p2 = pnand %p3378_p1, %p3372_p12 }
  0x83   :  { %1506 = vmatprep.subr.bf16.mxu1 %v2904_v43  ;;  %v2989_v43 = vld [vmem:[#allocation5 + $0x2e8] ss:$16 sps:$4 sm:$0xff]  }
  0x85   :  { %1345 = vmatpush1.bf16.msra.mxu0 %v2905_v45  ;;  %v2997_v45 = vld [vmem:[#allocation5 + $0x30c] ss:$16 sps:$4 sm:$0xff]  }
  0x86   :  { %1507 = vmatpush1.bf16.msra.mxu1 %v2902_v44  ;;  %1346 = vmatprep.subr.bf16.mxu0 %v2906_v46  ;;  %v2994_v44 = vld [vmem:[#allocation5 + $0x324] ss:$16 sps:$4 sm:$0xff]   ;;  %v2992_v46 = vld [vmem:[#allocation5 + $0x320] ss:$16 sps:$4 sm:$0xff]  }
  0x87   :  { %1508 = vmatprep.subr.bf16.mxu1 %v2910_v47  ;;  %v2995_v47 = vld [vmem:[#allocation5 + $0x308] ss:$16 sps:$4 sm:$0xff]  }
  0x89   :  { %1347 = vmatpush1.bf16.msra.mxu0 %v2911_v50  ;;  %v2998_v50 = vld [vmem:[#allocation5 + $0x340] ss:$16 sps:$4 sm:$0xff]  }
  0x8a   :  { %1509 = vmatpush1.bf16.msra.mxu1 %v2908_v48  ;;  %1348 = vmatprep.subr.bf16.mxu0 %v2912_v51  ;;  %v3000_v48 = vld [vmem:[#allocation5 + $0x344] ss:$16 sps:$4 sm:$0xff]   ;;  %v3001_v51 = vld [vmem:[#allocation5 + $0x328] ss:$16 sps:$4 sm:$0xff]  }
  0x8b   :  { %1510 = vmatprep.subr.bf16.mxu1 %v2916_v53  ;;  %v3009_v53 = vld [vmem:[#allocation5 + $0x34c] ss:$16 sps:$4 sm:$0xff]  }
  0x8d   :  { %1349 = vmatpush1.bf16.msra.mxu0 %v2917_v55  ;;  %v3007_v55 = vld [vmem:[#allocation5 + $0x348] ss:$16 sps:$4 sm:$0xff]  }
  0x8e   :  { %1511 = vmatpush1.bf16.msra.mxu1 %v2914_v54  ;;  %1350 = vmatprep.subr.bf16.mxu0 %v2918_v56  ;;  %v3004_v54 = vld [vmem:[#allocation5 + $0x360] ss:$16 sps:$4 sm:$0xff]   ;;  %v3012_v56 = vld [vmem:[#allocation5 + $0x384] ss:$16 sps:$4 sm:$0xff]  }
  0x8f   :  { %1512 = vmatprep.subr.bf16.mxu1 %v2922_v57  ;;  %v3015_v57 = vld [vmem:[#allocation5 + $0x36c] ss:$16 sps:$4 sm:$0xff]  }
  0x91   :  { %1351 = vmatpush1.bf16.msra.mxu0 %v2923_v59  ;;  %v3013_v59 = vld [vmem:[#allocation5 + $0x368] ss:$16 sps:$4 sm:$0xff]  }
  0x92   :  { %1513 = vmatpush1.bf16.msra.mxu1 %v2920_v58  ;;  %1352 = vmatprep.subr.bf16.mxu0 %v2924_v60  ;;  %v3010_v58 = vld [vmem:[#allocation5 + $0x380] ss:$16 sps:$4 sm:$0xff]   ;;  %v3018_v60 = vld [vmem:[#allocation5 + $0x3a4] ss:$16 sps:$4 sm:$0xff]  }
  0x93   :  { %1514 = vmatprep.subr.bf16.mxu1 %v2928_v61  ;;  %v3021_v61 = vld [vmem:[#allocation5 + $0x38c] ss:$16 sps:$4 sm:$0xff]  }
  0x95   :  { %1353 = vmatpush1.bf16.msra.mxu0 %v2929_v63  ;;  %v3019_v63 = vld [vmem:[#allocation5 + $0x388] ss:$16 sps:$4 sm:$0xff]  }
  0x96   :  { %1515 = vmatpush1.bf16.msra.mxu1 %v2926_v62  ;;  %1354 = vmatprep.subr.bf16.mxu0 %v2930_v1  ;;  %v3016_v62 = vld [vmem:[#allocation5 + $0x3a0] ss:$16 sps:$4 sm:$0xff]   ;;  %v3024_v1 = vld [vmem:[#allocation5 + $0x3c4] ss:$16 sps:$4 sm:$0xff]  }
  0x97   :  { %1516 = vmatprep.subr.bf16.mxu1 %v2934_v2  ;;  %v3027_v2 = vld [vmem:[#allocation5 + $0x3ac] ss:$16 sps:$4 sm:$0xff]  }
  0x99   :  { %1355 = vmatpush1.bf16.msra.mxu0 %v2935_v4  ;;  %v3025_v4 = vld [vmem:[#allocation5 + $0x3a8] ss:$16 sps:$4 sm:$0xff]  }
  0x9a   :  { %1517 = vmatpush1.bf16.msra.mxu1 %v2932_v3  ;;  %1365 = vmatprep.subr.bf16.mxu0 %v2940_v5  ;;  %v3022_v3 = vld [vmem:[#allocation5 + $0x3c0] ss:$16 sps:$4 sm:$0xff]   ;;  %v3030_v5 = vld [vmem:[#allocation5 + $0x3e4] ss:$16 sps:$4 sm:$0xff]  }
  0x9b   :  { %1518 = vmatprep.subr.bf16.mxu1 %v2943_v6  ;;  %v3033_v6 = vld [vmem:[#allocation5 + $0x3cc] ss:$16 sps:$4 sm:$0xff]  }
  0x9c   :  { %1357 = vmatmul.mubr.bf16.vlgmr.msra.gmra.mrb[0].mxu0 %v2446_v7 }
  0x9d   :  { %1366 = vmatpush1.bf16.msra.mxu0 %v2938_v8  ;;  %1397 = vmatprep.mubr.bf16.mxu0 %v2449_v35  ;;  %v3031_v8 = vld [vmem:[#allocation5 + $0x3c8] ss:$16 sps:$4 sm:$0xff]  }
  0x9e   :  { %1519 = vmatpush1.bf16.msra.mxu1 %v2941_v9  ;;  %1367 = vmatprep.subr.bf16.mxu0 %v2946_v10  ;;  %v3038_v9 = vld [vmem:[#allocation5 + $0x404] ss:$16 sps:$4 sm:$0xff]   ;;  %v3041_v10 = vld [vmem:[#allocation5 + $0x3ec] ss:$16 sps:$4 sm:$0xff]  }
  0x9f   :  { %1529 = vmatprep.subr.bf16.mxu1 %v2949_v11  ;;  %v2448_v11 = vcombine.low %v3526_v32, %v3526_v32  ;;  %v3068_v32 = vld [vmem:[#allocation5 + $0x4a4] ss:$16 sps:$4 sm:$0xff]  }
  0xa1   :  { %1521 = vmatmul.mubr.bf16.vlgmr.msra.gmra.mrb[4].mxu1 %v2446_v7  ;;  %1368 = vmatpush1.bf16.msra.mxu0 %v2944_v12  ;;  %v3028_v7 = vld [vmem:[#allocation5 + $0x3e0] ss:$16 sps:$4 sm:$0xff]  }
  0xa2   :  { %1530 = vmatpush1.bf16.msra.mxu1 %v2947_v13  ;;  %1369 = vmatprep.subr.bf16.mxu0 %v2952_v14  ;;  %v3036_v12 = vld [vmem:[#allocation5 + $0x400] ss:$16 sps:$4 sm:$0xff]   ;;  %v3039_v13 = vld [vmem:[#allocation5 + $0x3e8] ss:$16 sps:$4 sm:$0xff]   ;;  %v3044_v14 = vld [vmem:[#allocation5 + $0x424] ss:$16 sps:$4 sm:$0xff]  }
  0xa3   :  { %1531 = vmatprep.subr.bf16.mxu1 %v2955_v15  ;;  %1561 = vmatprep.mubr.bf16.mxu1 %v2449_v35  ;;  %v3047_v15 = vld [vmem:[#allocation5 + $0x40c] ss:$16 sps:$4 sm:$0xff]   ;;  %v3069_v35 = vld [vmem:[#allocation5 + $0x488] ss:$16 sps:$4 sm:$0xff]  }
  0xa5   :  { %1370 = vmatpush1.bf16.msra.mxu0 %v2950_v16  ;;  %v3532_v16 = vld [vmem:[#allocation2 + $0x10] sm:$0xff] }
  0xa6   :  { %1532 = vmatpush1.bf16.msra.mxu1 %v2953_v17  ;;  %1371 = vmatprep.subr.bf16.mxu0 %v2958_v18  ;;  %v2451_v17 = vcombine.high %v3532_v16, %v3532_v16  ;;  %v3042_v18 = vld [vmem:[#allocation5 + $0x420] ss:$16 sps:$4 sm:$0xff]  }
  0xa7   :  { %1533 = vmatprep.subr.bf16.mxu1 %v2961_v19  ;;  %v3045_v19 = vld [vmem:[#allocation5 + $0x408] ss:$16 sps:$4 sm:$0xff]  }
  0xa9   :  { %1372 = vmatpush1.bf16.msra.mxu0 %v2956_v20  ;;  %v3050_v20 = vld [vmem:[#allocation5 + $0x444] ss:$16 sps:$4 sm:$0xff]  }
  0xaa   :  { %1534 = vmatpush1.bf16.msra.mxu1 %v2959_v21  ;;  %1373 = vmatprep.subr.bf16.mxu0 %v2964_v22  ;;  %v3053_v21 = vld [vmem:[#allocation5 + $0x42c] ss:$16 sps:$4 sm:$0xff]   ;;  %v3048_v22 = vld [vmem:[#allocation5 + $0x440] ss:$16 sps:$4 sm:$0xff]  }
  0xab   :  { %1535 = vmatprep.subr.bf16.mxu1 %v2967_v23  ;;  %v3051_v23 = vld [vmem:[#allocation5 + $0x428] ss:$16 sps:$4 sm:$0xff]  }
  0xad   :  { %1374 = vmatpush1.bf16.msra.mxu0 %v2962_v24  ;;  %v3056_v24 = vld [vmem:[#allocation5 + $0x464] ss:$16 sps:$4 sm:$0xff]  }
  0xae   :  { %1536 = vmatpush1.bf16.msra.mxu1 %v2965_v25  ;;  %1375 = vmatprep.subr.bf16.mxu0 %v2970_v26  ;;  %v3059_v25 = vld [vmem:[#allocation5 + $0x44c] ss:$16 sps:$4 sm:$0xff]   ;;  %v3054_v26 = vld [vmem:[#allocation5 + $0x460] ss:$16 sps:$4 sm:$0xff]  }
  0xaf   :  { %1537 = vmatprep.subr.bf16.mxu1 %v2973_v27  ;;  %v3057_v27 = vld [vmem:[#allocation5 + $0x448] ss:$16 sps:$4 sm:$0xff]  }
  0xb1   :  { %1376 = vmatpush1.bf16.msra.mxu0 %v2968_v28  ;;  %v3062_v28 = vld [vmem:[#allocation5 + $0x484] ss:$16 sps:$4 sm:$0xff]  }
  0xb2   :  { %1538 = vmatpush1.bf16.msra.mxu1 %v2971_v29  ;;  %1377 = vmatprep.subr.bf16.mxu0 %v2976_v30  ;;  %v3065_v29 = vld [vmem:[#allocation5 + $0x46c] ss:$16 sps:$4 sm:$0xff]   ;;  %v3060_v30 = vld [vmem:[#allocation5 + $0x480] ss:$16 sps:$4 sm:$0xff]  }
  0xb3   :  { %1539 = vmatprep.subr.bf16.mxu1 %v2979_v31  ;;  %v3063_v31 = vld [vmem:[#allocation5 + $0x468] ss:$16 sps:$4 sm:$0xff]  }
  0xb5   :  { %1378 = vmatpush1.bf16.msra.mxu0 %v2974_v33  ;;  %v3071_v33 = vld [vmem:[#allocation5 + $0x48c] ss:$16 sps:$4 sm:$0xff]  }
  0xb6   :  { %1540 = vmatpush1.bf16.msra.mxu1 %v2977_v34  ;;  %1379 = vmatprep.subr.bf16.mxu0 %v2982_v36  ;;  %v3066_v34 = vld [vmem:[#allocation5 + $0x4a0] ss:$16 sps:$4 sm:$0xff]   ;;  %v3074_v36 = vld [vmem:[#allocation5 + $0x4c4] ss:$16 sps:$4 sm:$0xff]  }
  0xb7   :  { %1541 = vmatprep.subr.bf16.mxu1 %v2985_v37  ;;  %v3077_v37 = vld [vmem:[#allocation5 + $0x4ac] ss:$16 sps:$4 sm:$0xff]  }
  0xb9   :  { %1380 = vmatpush1.bf16.msra.mxu0 %v2980_v38  ;;  %v3072_v38 = vld [vmem:[#allocation5 + $0x4c0] ss:$16 sps:$4 sm:$0xff]  }
  0xba   :  { %1542 = vmatpush1.bf16.msra.mxu1 %v2983_v39  ;;  %1381 = vmatprep.subr.bf16.mxu0 %v2988_v40  ;;  %v3075_v39 = vld [vmem:[#allocation5 + $0x4a8] ss:$16 sps:$4 sm:$0xff]   ;;  %v3080_v40 = vld [vmem:[#allocation5 + $0x4e4] ss:$16 sps:$4 sm:$0xff]  }
  0xbb   :  { %1543 = vmatprep.subr.bf16.mxu1 %v2991_v41  ;;  %v3083_v41 = vld [vmem:[#allocation5 + $0x4cc] ss:$16 sps:$4 sm:$0xff]  }
  0xbd   :  { %1382 = vmatpush1.bf16.msra.mxu0 %v2986_v42  ;;  %v3078_v42 = vld [vmem:[#allocation5 + $0x4e0] ss:$16 sps:$4 sm:$0xff]  }
  0xbe   :  { %1544 = vmatpush1.bf16.msra.mxu1 %v2989_v43  ;;  %1383 = vmatprep.subr.bf16.mxu0 %v2994_v44  ;;  %v3081_v43 = vld [vmem:[#allocation5 + $0x4c8] ss:$16 sps:$4 sm:$0xff]   ;;  %v3086_v44 = vld [vmem:[#allocation5 + $0x504] ss:$16 sps:$4 sm:$0xff]  }
  0xbf   :  { %1545 = vmatprep.subr.bf16.mxu1 %v2997_v45  ;;  %v3089_v45 = vld [vmem:[#allocation5 + $0x4ec] ss:$16 sps:$4 sm:$0xff]  }
  0xc1   :  { %1384 = vmatpush1.bf16.msra.mxu0 %v2992_v46  ;;  %v3084_v46 = vld [vmem:[#allocation5 + $0x500] ss:$16 sps:$4 sm:$0xff]  }
  0xc2   :  { %1546 = vmatpush1.bf16.msra.mxu1 %v2995_v47  ;;  %1385 = vmatprep.subr.bf16.mxu0 %v3000_v48  ;;  %v3087_v47 = vld [vmem:[#allocation5 + $0x4e8] ss:$16 sps:$4 sm:$0xff]   ;;  %v3092_v48 = vld [vmem:[#allocation5 + $0x524] ss:$16 sps:$4 sm:$0xff]  }
  0xc3   :  { %1547 = vmatprep.subr.bf16.mxu1 %v3003_v49  ;;  %v3095_v49 = vld [vmem:[#allocation5 + $0x50c] ss:$16 sps:$4 sm:$0xff]  }
  0xc5   :  { %1386 = vmatpush1.bf16.msra.mxu0 %v2998_v50  ;;  %v3090_v50 = vld [vmem:[#allocation5 + $0x520] ss:$16 sps:$4 sm:$0xff]  }
  0xc6   :  { %1548 = vmatpush1.bf16.msra.mxu1 %v3001_v51  ;;  %1387 = vmatprep.subr.bf16.mxu0 %v3006_v52  ;;  %v3093_v51 = vld [vmem:[#allocation5 + $0x508] ss:$16 sps:$4 sm:$0xff]   ;;  %v3098_v52 = vld [vmem:[#allocation5 + $0x544] ss:$16 sps:$4 sm:$0xff]  }
  0xc7   :  { %1549 = vmatprep.subr.bf16.mxu1 %v3009_v53  ;;  %v3101_v53 = vld [vmem:[#allocation5 + $0x52c] ss:$16 sps:$4 sm:$0xff]  }
  0xc9   :  { %1388 = vmatpush1.bf16.msra.mxu0 %v3004_v54  ;;  %v3096_v54 = vld [vmem:[#allocation5 + $0x540] ss:$16 sps:$4 sm:$0xff]  }
  0xca   :  { %1550 = vmatpush1.bf16.msra.mxu1 %v3007_v55  ;;  %1389 = vmatprep.subr.bf16.mxu0 %v3012_v56  ;;  %v3099_v55 = vld [vmem:[#allocation5 + $0x528] ss:$16 sps:$4 sm:$0xff]   ;;  %v3104_v56 = vld [vmem:[#allocation5 + $0x564] ss:$16 sps:$4 sm:$0xff]  }
  0xcb   :  { %1551 = vmatprep.subr.bf16.mxu1 %v3015_v57  ;;  %v3107_v57 = vld [vmem:[#allocation5 + $0x54c] ss:$16 sps:$4 sm:$0xff]  }
  0xcd   :  { %1390 = vmatpush1.bf16.msra.mxu0 %v3010_v58  ;;  %v3102_v58 = vld [vmem:[#allocation5 + $0x560] ss:$16 sps:$4 sm:$0xff]  }
  0xce   :  { %1552 = vmatpush1.bf16.msra.mxu1 %v3013_v59  ;;  %1391 = vmatprep.subr.bf16.mxu0 %v3018_v60  ;;  %v3105_v59 = vld [vmem:[#allocation5 + $0x548] ss:$16 sps:$4 sm:$0xff]   ;;  %v3110_v60 = vld [vmem:[#allocation5 + $0x584] ss:$16 sps:$4 sm:$0xff]  }
  0xcf   :  { %1553 = vmatprep.subr.bf16.mxu1 %v3021_v61  ;;  %v3113_v61 = vld [vmem:[#allocation5 + $0x56c] ss:$16 sps:$4 sm:$0xff]  }
  0xd1   :  { %1392 = vmatpush1.bf16.msra.mxu0 %v3016_v62  ;;  %v3108_v62 = vld [vmem:[#allocation5 + $0x580] ss:$16 sps:$4 sm:$0xff]  }
  0xd2   :  { %1554 = vmatpush1.bf16.msra.mxu1 %v3019_v63  ;;  %1393 = vmatprep.subr.bf16.mxu0 %v3024_v1  ;;  %v3111_v63 = vld [vmem:[#allocation5 + $0x568] ss:$16 sps:$4 sm:$0xff]   ;;  %v3116_v1 = vld [vmem:[#allocation5 + $0x5a4] ss:$16 sps:$4 sm:$0xff]  }
  0xd3   :  { %1555 = vmatprep.subr.bf16.mxu1 %v3027_v2  ;;  %v3119_v2 = vld [vmem:[#allocation5 + $0x58c] ss:$16 sps:$4 sm:$0xff]  }
  0xd5   :  { %1394 = vmatpush1.bf16.msra.mxu0 %v3022_v3  ;;  %v3114_v3 = vld [vmem:[#allocation5 + $0x5a0] ss:$16 sps:$4 sm:$0xff]  }
  0xd6   :  { %1556 = vmatpush1.bf16.msra.mxu1 %v3025_v4  ;;  %1395 = vmatprep.subr.bf16.mxu0 %v3030_v5  ;;  %v3117_v4 = vld [vmem:[#allocation5 + $0x588] ss:$16 sps:$4 sm:$0xff]   ;;  %v3122_v5 = vld [vmem:[#allocation5 + $0x5c4] ss:$16 sps:$4 sm:$0xff]  }
  0xd7   :  { %1557 = vmatprep.subr.bf16.mxu1 %v3033_v6  ;;  %v3125_v6 = vld [vmem:[#allocation5 + $0x5ac] ss:$16 sps:$4 sm:$0xff]  }
  0xd9   :  { %1396 = vmatpush1.bf16.msra.mxu0 %v3028_v7  ;;  %v3120_v7 = vld [vmem:[#allocation5 + $0x5c0] ss:$16 sps:$4 sm:$0xff]  }
  0xda   :  { %1558 = vmatpush1.bf16.msra.mxu1 %v3031_v8  ;;  %1406 = vmatprep.subr.bf16.mxu0 %v3038_v9  ;;  %v3123_v8 = vld [vmem:[#allocation5 + $0x5a8] ss:$16 sps:$4 sm:$0xff]   ;;  %v3128_v9 = vld [vmem:[#allocation5 + $0x5e4] ss:$16 sps:$4 sm:$0xff]  }
  0xdb   :  { %1559 = vmatprep.subr.bf16.mxu1 %v3041_v10  ;;  %v3131_v10 = vld [vmem:[#allocation5 + $0x5cc] ss:$16 sps:$4 sm:$0xff]  }
  0xdc   :  { %1398 = vmatmul.mubr.bf16.vlgmr.msra.gmra.mrb[0].mxu0 %v2448_v11 }
  0xdd   :  { %1407 = vmatpush1.bf16.msra.mxu0 %v3036_v12  ;;  %1438 = vmatprep.mubr.bf16.mxu0 %v2451_v17  ;;  %v3129_v12 = vld [vmem:[#allocation5 + $0x5c8] ss:$16 sps:$4 sm:$0xff]  }
  0xde   :  { %1560 = vmatpush1.bf16.msra.mxu1 %v3039_v13  ;;  %1408 = vmatprep.subr.bf16.mxu0 %v3044_v14  ;;  %v3136_v13 = vld [vmem:[#allocation5 + $0x5ec] ss:$16 sps:$4 sm:$0xff]  }
  0xdf   :  { %1570 = vmatprep.subr.bf16.mxu1 %v3047_v15  ;;  %v3142_v14 = vld [vmem:[#allocation7 + $0x4] ss:$8 sps:$4 sm:$0xff]   ;;  %v2450_v15 = vcombine.low %v3532_v16, %v3532_v16  ;;  %v3146_v16 = vld [vmem:[#allocation7 + $0x20] ss:$8 sps:$4 sm:$0xff]  }
  0xe1   :  { %1562 = vmatmul.mubr.bf16.vlgmr.msra.gmra.mrb[4].mxu1 %v2448_v11  ;;  %1409 = vmatpush1.bf16.msra.mxu0 %v3042_v18  ;;  %v3126_v11 = vld [vmem:[#allocation5 + $0x5e0] ss:$16 sps:$4 sm:$0xff]  }
  0xe2   :  { %1571 = vmatpush1.bf16.msra.mxu1 %v3045_v19  ;;  %1410 = vmatprep.subr.bf16.mxu0 %v3050_v20  ;;  %v3140_v18 = vld [vmem:[#allocation7] ss:$8 sps:$4 sm:$0xff]   ;;  %v3139_v19 = vld [vmem:[#allocation5 + $0x60c] ss:$16 sps:$4 sm:$0xff]  }
  0xe3   :  { %1572 = vmatprep.subr.bf16.mxu1 %v3053_v21  ;;  %1602 = vmatprep.mubr.bf16.mxu1 %v2451_v17  ;;  %v3134_v17 = vld [vmem:[#allocation5 + $0x5e8] ss:$16 sps:$4 sm:$0xff]   ;;  %v3145_v20 = vld [vmem:[#allocation7 + $0x14] ss:$8 sps:$4 sm:$0xff]  }
  0xe4   :  { %v3137_v21 = vld [vmem:[#allocation5 + $0x608] ss:$16 sps:$4 sm:$0xff]  }
  0xe5   :  { %1411 = vmatpush1.bf16.msra.mxu0 %v3048_v22  ;;  %v3143_v22 = vld [vmem:[#allocation7 + $0x10] ss:$8 sps:$4 sm:$0xff]  }
  0xe6   :  { %1573 = vmatpush1.bf16.msra.mxu1 %v3051_v23  ;;  %1412 = vmatprep.subr.bf16.mxu0 %v3056_v24  ;;  %v3148_v23 = vld [vmem:[#allocation7 + $0x24] ss:$8 sps:$4 sm:$0xff]   ;;  %v3151_v24 = vld [vmem:[#allocation7 + $0x34] ss:$8 sps:$4 sm:$0xff]  }
  0xe7   :  { %1574 = vmatprep.subr.bf16.mxu1 %v3059_v25  ;;  %v3149_v25 = vld [vmem:[#allocation7 + $0x30] ss:$8 sps:$4 sm:$0xff]  }
  0xe9   :  { %1413 = vmatpush1.bf16.msra.mxu0 %v3054_v26  ;;  %v3154_v26 = vld [vmem:[#allocation7 + $0x44] ss:$8 sps:$4 sm:$0xff]  }
  0xea   :  { %1575 = vmatpush1.bf16.msra.mxu1 %v3057_v27  ;;  %1414 = vmatprep.subr.bf16.mxu0 %v3062_v28  ;;  %v3152_v27 = vld [vmem:[#allocation7 + $0x40] ss:$8 sps:$4 sm:$0xff]   ;;  %v3157_v28 = vld [vmem:[#allocation7 + $0x54] ss:$8 sps:$4 sm:$0xff]  }
  0xeb   :  { %1576 = vmatprep.subr.bf16.mxu1 %v3065_v29  ;;  %v3260_v29 = vld [vmem:[#allocation2 + $0x18] ss:$0 sps:$4 sm:$0xff]  }
  0xed   :  { %1415 = vmatpush1.bf16.msra.mxu0 %v3060_v30  ;;  %v3155_v30 = vld [vmem:[#allocation7 + $0x50] ss:$8 sps:$4 sm:$0xff]  }
  0xee   :  { %1577 = vmatpush1.bf16.msra.mxu1 %v3063_v31  ;;  %1416 = vmatprep.subr.bf16.mxu0 %v3068_v32  ;;  %v3160_v31 = vld [vmem:[#allocation7 + $0x64] ss:$8 sps:$4 sm:$0xff]  }
  0xef   :  { %1578 = vmatprep.subr.bf16.mxu1 %v3071_v33  ;;  %v3163_v33 = vld [vmem:[#allocation7 + $0x74] ss:$8 sps:$4 sm:$0xff]  }
  0xf1   :  { %1417 = vmatpush1.bf16.msra.mxu0 %v3066_v34 }
  0xf2   :  { %1579 = vmatpush1.bf16.msra.mxu1 %v3069_v35  ;;  %1418 = vmatprep.subr.bf16.mxu0 %v3074_v36 }
  0xf3   :  { %1580 = vmatprep.subr.bf16.mxu1 %v3077_v37  ;;  %v3161_v37 = vld [vmem:[#allocation7 + $0x70] ss:$8 sps:$4 sm:$0xff]  }
  0xf5   :  { %1419 = vmatpush1.bf16.msra.mxu0 %v3072_v38  ;;  %v3166_v38 = vld [vmem:[#allocation7 + $0x84] ss:$8 sps:$4 sm:$0xff]  }
  0xf6   :  { %1581 = vmatpush1.bf16.msra.mxu1 %v3075_v39  ;;  %1420 = vmatprep.subr.bf16.mxu0 %v3080_v40  ;;  %v3164_v39 = vld [vmem:[#allocation7 + $0x80] ss:$8 sps:$4 sm:$0xff]   ;;  %v3169_v40 = vld [vmem:[#allocation7 + $0x94] ss:$8 sps:$4 sm:$0xff]  }
  0xf7   :  { %1582 = vmatprep.subr.bf16.mxu1 %v3083_v41  ;;  %v3167_v41 = vld [vmem:[#allocation7 + $0x90] ss:$8 sps:$4 sm:$0xff]  }
  0xf9   :  { %1421 = vmatpush1.bf16.msra.mxu0 %v3078_v42  ;;  %v3172_v42 = vld [vmem:[#allocation7 + $0xa4] ss:$8 sps:$4 sm:$0xff]  }
  0xfa   :  { %1583 = vmatpush1.bf16.msra.mxu1 %v3081_v43  ;;  %1422 = vmatprep.subr.bf16.mxu0 %v3086_v44  ;;  %v3170_v43 = vld [vmem:[#allocation7 + $0xa0] ss:$8 sps:$4 sm:$0xff]   ;;  %v3175_v44 = vld [vmem:[#allocation7 + $0xb4] ss:$8 sps:$4 sm:$0xff]  }
  0xfb   :  { %1584 = vmatprep.subr.bf16.mxu1 %v3089_v45  ;;  %v3173_v45 = vld [vmem:[#allocation7 + $0xb0] ss:$8 sps:$4 sm:$0xff]  }
  0xfd   :  { %1423 = vmatpush1.bf16.msra.mxu0 %v3084_v46  ;;  %v3178_v46 = vld [vmem:[#allocation7 + $0xc4] ss:$8 sps:$4 sm:$0xff]  }
  0xfe   :  { %1585 = vmatpush1.bf16.msra.mxu1 %v3087_v47  ;;  %1424 = vmatprep.subr.bf16.mxu0 %v3092_v48  ;;  %v3176_v47 = vld [vmem:[#allocation7 + $0xc0] ss:$8 sps:$4 sm:$0xff]   ;;  %v3181_v48 = vld [vmem:[#allocation7 + $0xd4] ss:$8 sps:$4 sm:$0xff]  }
  0xff   :  { %1586 = vmatprep.subr.bf16.mxu1 %v3095_v49  ;;  %v3179_v49 = vld [vmem:[#allocation7 + $0xd0] ss:$8 sps:$4 sm:$0xff]  }
 0x101   :  { %1425 = vmatpush1.bf16.msra.mxu0 %v3090_v50  ;;  %v3184_v50 = vld [vmem:[#allocation7 + $0xe4] ss:$8 sps:$4 sm:$0xff]  }
 0x102   :  { %1587 = vmatpush1.bf16.msra.mxu1 %v3093_v51  ;;  %1426 = vmatprep.subr.bf16.mxu0 %v3098_v52  ;;  %v3182_v51 = vld [vmem:[#allocation7 + $0xe0] ss:$8 sps:$4 sm:$0xff]   ;;  %v3187_v52 = vld [vmem:[#allocation7 + $0xf4] ss:$8 sps:$4 sm:$0xff]  }
 0x103   :  { %1588 = vmatprep.subr.bf16.mxu1 %v3101_v53  ;;  %v3185_v53 = vld [vmem:[#allocation7 + $0xf0] ss:$8 sps:$4 sm:$0xff]  }
 0x105   :  { %1427 = vmatpush1.bf16.msra.mxu0 %v3096_v54  ;;  %v3190_v54 = vld [vmem:[#allocation7 + $0x104] ss:$8 sps:$4 sm:$0xff]  }
 0x106   :  { %1589 = vmatpush1.bf16.msra.mxu1 %v3099_v55  ;;  %1428 = vmatprep.subr.bf16.mxu0 %v3104_v56  ;;  %v3236_v55 = vld [vmem:[#allocation8 + $0x40] sm:$0xff]  }
 0x107   :  { %1590 = vmatprep.subr.bf16.mxu1 %v3107_v57  ;;  %v3237_v56 = vld [vmem:[#allocation8] sm:$0xff]   ;;  %v3238_v57 = vld [vmem:[#allocation8 + $0x48] sm:$0xff]  }
 0x109   :  { %1429 = vmatpush1.bf16.msra.mxu0 %v3102_v58  ;;  %v3239_v58 = vld [vmem:[#allocation8 + $0x8] sm:$0xff]  }
 0x10a   :  { %1591 = vmatpush1.bf16.msra.mxu1 %v3105_v59  ;;  %1430 = vmatprep.subr.bf16.mxu0 %v3110_v60  ;;  %v3240_v59 = vld [vmem:[#allocation8 + $0x50] sm:$0xff]  }
 0x10b   :  { %1592 = vmatprep.subr.bf16.mxu1 %v3113_v61  ;;  %v3241_v60 = vld [vmem:[#allocation8 + $0x10] sm:$0xff]   ;;  %v3242_v61 = vld [vmem:[#allocation8 + $0x58] sm:$0xff]  }
 0x10d   :  { %1431 = vmatpush1.bf16.msra.mxu0 %v3108_v62  ;;  %v3243_v62 = vld [vmem:[#allocation8 + $0x18] sm:$0xff]  }
 0x10e   :  { %1593 = vmatpush1.bf16.msra.mxu1 %v3111_v63  ;;  %1432 = vmatprep.subr.bf16.mxu0 %v3116_v1  ;;  %v3244_v63 = vld [vmem:[#allocation8 + $0x60] sm:$0xff]  }
 0x10f   :  { %1594 = vmatprep.subr.bf16.mxu1 %v3119_v2  ;;  %v3245_v1 = vld [vmem:[#allocation8 + $0x20] sm:$0xff]   ;;  %v3246_v2 = vld [vmem:[#allocation8 + $0x68] sm:$0xff]  }
 0x111   :  { %1433 = vmatpush1.bf16.msra.mxu0 %v3114_v3  ;;  %v3247_v3 = vld [vmem:[#allocation8 + $0x28] sm:$0xff]  }
 0x112   :  { %1595 = vmatpush1.bf16.msra.mxu1 %v3117_v4  ;;  %1434 = vmatprep.subr.bf16.mxu0 %v3122_v5  ;;  %v296_v4 = vlaneseq }
 0x113   :  { %1596 = vmatprep.subr.bf16.mxu1 %v3125_v6 }
 0x114   :  { %v3544_v5 = vshrl.u32 %v296_v4, 7  ;;  %v3248_v4 = vld [vmem:[#allocation8 + $0x70] sm:$0xff]  }
 0x115   :  { %1435 = vmatpush1.bf16.msra.mxu0 %v3120_v7  ;;  %v3550_v7 = vld [vmem:[%s3595_s5] sm:$0xf] }
 0x116   :  { %1597 = vmatpush1.bf16.msra.mxu1 %v3123_v8  ;;  %1436 = vmatprep.subr.bf16.mxu0 %v3128_v9  ;;  %v298_v6 = vsub.s32 0, %v3544_v5  ;;  %v302_v8 = vsub.s32 1, %v3544_v5 }
 0x117   :  { %1598 = vmatprep.subr.bf16.mxu1 %v3131_v10 }
 0x118   :  { %v299_v9 = vrot.slane %v3550_v7, %v298_v6  ;;  %v303_v10 = vrot.slane %v3550_v7, %v302_v8 }
 0x119   :  { %1437 = vmatpush1.bf16.msra.mxu0 %v3126_v11 }
 0x11a   :  { %1599 = vmatpush1.bf16.msra.mxu1 %v3129_v12  ;;  %2055 = vmatprep.subr.bf16.mxu0 %v3142_v14 }
 0x11b   :  { %1600 = vmatprep.subr.bf16.mxu1 %v3136_v13 }
 0x11c   :  { %1439 = vmatmul.mubr.bf16.vlgmr.msra.gmra.mrb[0].mxu0 %v2450_v15 }
 0x11d   :  { %2056 = vmatpush1.bf16.msra.mxu0 %v3140_v18 }
 0x11e   :  { %1601 = vmatpush1.bf16.msra.mxu1 %v3134_v17  ;;  %2057 = vmatprep.subr.bf16.mxu0 %v3145_v20 }
 0x11f   :  { %1611 = vmatprep.subr.bf16.mxu1 %v3139_v19 }
 0x121   :  { %1603 = vmatmul.mubr.bf16.vlgmr.msra.gmra.mrb[4].mxu1 %v2450_v15  ;;  %2058 = vmatpush1.bf16.msra.mxu0 %v3143_v22 }
 0x122   :  { %1612 = vmatpush1.bf16.msra.mxu1 %v3137_v21  ;;  %1643 = vmatprep.mubr.bf16.mxu1 %v3412_v0  ;;  %v3158_v0 = vld [vmem:[#allocation7 + $0x60] ss:$8 sps:$4 sm:$0xff]  }
 0x123   :  { %2059 = vmatprep.subr.bf16.mxu0 %v3148_v23  ;;  %2741 = vmatprep.subr.bf16.mxu1 %v3236_v55  ;;  %v3188_v23 = vld [vmem:[#allocation7 + $0x100] ss:$8 sps:$4 sm:$0xff]  }
 0x124   :  { %v3224_v55 = vld [vmem:[#allocation7 + $0x1c0] ss:$8 sps:$4 sm:$0xff]  }
 0x125   :  { %2060 = vmatpush1.bf16.msra.mxu0 %v3146_v16 }
 0x126   :  { %2061 = vmatprep.subr.bf16.mxu0 %v3151_v24  ;;  %v3193_v24 = vld [vmem:[#allocation7 + $0x114] ss:$8 sps:$4 sm:$0xff]  }
 0x129   :  { %2062 = vmatpush1.bf16.msra.mxu0 %v3149_v25  ;;  %v310_v25 = vsub.s32 3, %v3544_v5 }
 0x12a   :  { %2063 = vmatprep.subr.bf16.mxu0 %v3154_v26  ;;  %v3191_v26 = vld [vmem:[#allocation7 + $0x110] ss:$8 sps:$4 sm:$0xff]  }
 0x12d   :  { %2650 = vmatmul.mubr.msk.bf16.vlgmr.msra.gmra.mrb[4].mxu1 %vm1320_vm0, %v3260_v29  ;;  %2064 = vmatpush1.bf16.msra.mxu0 %v3152_v27  ;;  %v3196_v27 = vld [vmem:[#allocation7 + $0x124] ss:$8 sps:$4 sm:$0xff]  }
 0x12e   :  { %2065 = vmatprep.subr.bf16.mxu0 %v3157_v28  ;;  %2742 = vmatpush3.bf16.msra.mxu1 %v3237_v56  ;;  %v311_v28 = vrot.slane %v3550_v7, %v310_v25  ;;  %v306_v56 = vsub.s32 2, %v3544_v5  ;;  %v3255_v5 = vld [vmem:[#allocation10 + $0x18] sm:$0xff]  }
 0x12f   :  { %2743 = vmatprep.subr.bf16.mxu1 %v3238_v57  ;;  %v3229_v57 = vld [vmem:[#allocation7 + $0x1d4] ss:$8 sps:$4 sm:$0xff]  }
 0x131   :  { %2066 = vmatpush1.bf16.msra.mxu0 %v3155_v30  ;;  %v3194_v30 = vld [vmem:[#allocation7 + $0x120] ss:$8 sps:$4 sm:$0xff]  }
 0x132   :  { %2067 = vmatprep.subr.bf16.mxu0 %v3160_v31  ;;  %2744 = vmatpush3.bf16.msra.mxu1 %v3239_v58  ;;  %v3227_v58 = vld [vmem:[#allocation7 + $0x1d0] ss:$8 sps:$4 sm:$0xff]  }
 0x133   :  { %2745 = vmatprep.subr.bf16.mxu1 %v3240_v59  ;;  %v307_v59 = vrot.slane %v3550_v7, %v306_v56  ;;  %v3251_v7 = vld [vmem:[#allocation8 + $0x38] sm:$0xff]  }
 0x134   :  { %v3540_v32 = vpop.f32.mrb[0].mxu1 }
 0x135   :  { %v3542_v34 = vpop.f32.mrb[1].mxu1  ;;  %2068 = vmatpush1.bf16.msra.mxu0 %v3158_v0  ;;  %v3199_v0 = vld [vmem:[#allocation7 + $0x134] ss:$8 sps:$4 sm:$0xff]  }
 0x136   :  { %v1485_v35 = vpop.f32.mrb[2].mxu1  ;;  %2069 = vmatprep.subr.bf16.mxu0 %v3163_v33  ;;  %2746 = vmatpush3.bf16.msra.mxu1 %v3241_v60  ;;  %v3232_v60 = vld [vmem:[#allocation7 + $0x1e4] ss:$8 sps:$4 sm:$0xff]  }
 0x137   :  { %v1486_v36 = vpop.f32.mrb[3].mxu1  ;;  %2747 = vmatprep.subr.bf16.mxu1 %v3242_v61  ;;  %v3230_v61 = vld [vmem:[#allocation7 + $0x1e0] ss:$8 sps:$4 sm:$0xff]  }
 0x138   :  { %v3197_v36 = vld [vmem:[#allocation7 + $0x130] ss:$8 sps:$4 sm:$0xff]  }
 0x139   :  { %2070 = vmatpush1.bf16.msra.mxu0 %v3161_v37  ;;  %v3202_v37 = vld [vmem:[#allocation7 + $0x144] ss:$8 sps:$4 sm:$0xff]  }
 0x13a   :  { %2071 = vmatprep.subr.bf16.mxu0 %v3166_v38  ;;  %2748 = vmatpush3.bf16.msra.mxu1 %v3243_v62 }
 0x13b   :  { %2749 = vmatprep.subr.bf16.mxu1 %v3244_v63  ;;  %v3235_v63 = vld [vmem:[#allocation7 + $0x1f4] ss:$8 sps:$4 sm:$0xff]  }
 0x13d   :  { %2072 = vmatpush1.bf16.msra.mxu0 %v3164_v39  ;;  %v3200_v39 = vld [vmem:[#allocation7 + $0x140] ss:$8 sps:$4 sm:$0xff]  }
 0x13e   :  { %2073 = vmatprep.subr.bf16.mxu0 %v3169_v40  ;;  %2750 = vmatpush3.bf16.msra.mxu1 %v3245_v1  ;;  %v3205_v40 = vld [vmem:[#allocation7 + $0x154] ss:$8 sps:$4 sm:$0xff]   ;;  %v3233_v1 = vld [vmem:[#allocation7 + $0x1f0] ss:$8 sps:$4 sm:$0xff]  }
 0x13f   :  { %2751 = vmatprep.subr.bf16.mxu1 %v3246_v2 }
 0x141   :  { %2074 = vmatpush1.bf16.msra.mxu0 %v3167_v41  ;;  %v3203_v41 = vld [vmem:[#allocation7 + $0x150] ss:$8 sps:$4 sm:$0xff]  }
 0x142   :  { %2075 = vmatprep.subr.bf16.mxu0 %v3172_v42  ;;  %2752 = vmatpush3.bf16.msra.mxu1 %v3247_v3  ;;  %v3208_v42 = vld [vmem:[#allocation7 + $0x164] ss:$8 sps:$4 sm:$0xff]  }
 0x143   :  { %2753 = vmatprep.subr.bf16.mxu1 %v3248_v4 }
 0x145   :  { %2076 = vmatpush1.bf16.msra.mxu0 %v3170_v43  ;;  %v3206_v43 = vld [vmem:[#allocation7 + $0x160] ss:$8 sps:$4 sm:$0xff]  }
 0x146   :  { %2077 = vmatprep.subr.bf16.mxu0 %v3175_v44  ;;  %v3211_v44 = vld [vmem:[#allocation7 + $0x174] ss:$8 sps:$4 sm:$0xff]  }
 0x149   :  { %2078 = vmatpush1.bf16.msra.mxu0 %v3173_v45  ;;  %v3209_v45 = vld [vmem:[#allocation7 + $0x170] ss:$8 sps:$4 sm:$0xff]  }
 0x14a   :  { %2079 = vmatprep.subr.bf16.mxu0 %v3178_v46  ;;  %v3214_v46 = vld [vmem:[#allocation7 + $0x184] ss:$8 sps:$4 sm:$0xff]  }
 0x14d   :  { %2080 = vmatpush1.bf16.msra.mxu0 %v3176_v47  ;;  %v3212_v47 = vld [vmem:[#allocation7 + $0x180] ss:$8 sps:$4 sm:$0xff]  }
 0x14e   :  { %2081 = vmatprep.subr.bf16.mxu0 %v3181_v48  ;;  %v3217_v48 = vld [vmem:[#allocation7 + $0x194] ss:$8 sps:$4 sm:$0xff]  }
 0x151   :  { %2082 = vmatpush1.bf16.msra.mxu0 %v3179_v49  ;;  %v3215_v49 = vld [vmem:[#allocation7 + $0x190] ss:$8 sps:$4 sm:$0xff]  }
 0x152   :  { %2083 = vmatprep.subr.bf16.mxu0 %v3184_v50  ;;  %v3220_v50 = vld [vmem:[#allocation7 + $0x1a4] ss:$8 sps:$4 sm:$0xff]  }
 0x155   :  { %2084 = vmatpush1.bf16.msra.mxu0 %v3182_v51  ;;  %v3218_v51 = vld [vmem:[#allocation7 + $0x1a0] ss:$8 sps:$4 sm:$0xff]  }
 0x156   :  { %2085 = vmatprep.subr.bf16.mxu0 %v3187_v52  ;;  %v3223_v52 = vld [vmem:[#allocation7 + $0x1b4] ss:$8 sps:$4 sm:$0xff]  }
 0x159   :  { %2086 = vmatpush1.bf16.msra.mxu0 %v3185_v53  ;;  %v3221_v53 = vld [vmem:[#allocation7 + $0x1b0] ss:$8 sps:$4 sm:$0xff]  }
 0x15a   :  { %2096 = vmatprep.subr.bf16.mxu0 %v3190_v54  ;;  %v3226_v54 = vld [vmem:[#allocation7 + $0x1c4] ss:$8 sps:$4 sm:$0xff]  }
 0x1ef   :  { %v1440_v11 = vpop.f32.mrb[0].mxu0 }
 0x1f0   :  { %v2792_v12 = vadd.f32 %v1440_v11, %v299_v9  ;;  %v1442_v13 = vpop.f32.mrb[1].mxu0  ;;  %v3249_v9 = vld [vmem:[#allocation8 + $0x30] sm:$0xff]   ;;  %v3413_v11 = vmov 0.0  }
 0x1f1   :  { %v2794_v14 = vadd.f32 %v1442_v13, %v303_v10  ;;  %v1444_v15 = vpop.f32.mrb[2].mxu0  ;;  %2754 = vmatpush3.bf16.msra.mxu1 %v3249_v9  ;;  %v3250_v10 = vld [vmem:[#allocation8 + $0x78] sm:$0xff]  }
 0x1f2   :  { %v2793_v17 = vadd.f32 %v2792_v12, %v3540_v32  ;;  %v1445_v18 = vpop.f32.mrb[3].mxu0  ;;  %2755 = vmatprep.subr.bf16.mxu1 %v3250_v10  ;;  %v92_v12 = vld [vmem:[%s3595_s5 + $0x4] sm:$0x3] }
 0x1f3   :  { %v2795_v19 = vadd.f32 %v2794_v14, %v3542_v34  ;;  %v1728_v13 = vrot.slane %v92_v12, %v298_v6  ;;  %v1732_v14 = vrot.slane %v92_v12, %v302_v8  ;;  %v3254_v6 = vld [vmem:[#allocation10 + $0x10] sm:$0xff]   ;;  %v3256_v8 = vld [vmem:[#allocation10 + $0x20] sm:$0xff]  }
 0x1f4   :  { %v1652_v20 = vmax.f32 %v2793_v17, 0.0 }
 0x1f5   :  { %v1653_v21 = vmax.f32 %v2795_v19, 0.0  ;;  %2756 = vmatpush3.bf16.msra.mxu1 %v3251_v7 }
 0x1f6   :  { %v1656_v16 = vpack.c.bf16 %v1652_v20, %v1652_v20  ;;  %2772 = vmatprep.subr.bf16.mxu1 %v3413_v11 }
 0x1f7   :  { %v1657_v22 = vpack.c.bf16 %v1653_v21, %v1653_v21 }
 0x1f9   :  { %2087 = vmatprep.mubr.bf16.mxu0 %v1657_v22 }
 0x1fa   :  { %2088 = vmatmul.mubr.bf16.vlgmr.msra.gmra.mrb[4].mxu0 %v1656_v16 }
 0x1fb   :  { %2097 = vmatpush1.bf16.msra.mxu0 %v3188_v23 }
 0x1fc   :  { %2098 = vmatprep.subr.bf16.mxu0 %v3193_v24  ;;  %v3252_v24 = vld [vmem:[#allocation10] sm:$0xff]  }
 0x1ff   :  { %2099 = vmatpush1.bf16.msra.mxu0 %v3191_v26  ;;  %v3253_v26 = vld [vmem:[#allocation10 + $0x8] sm:$0xff]  }
 0x200   :  { %v1645_v29 = vpop.f32.mrb[4].mxu1  ;;  %2100 = vmatprep.subr.bf16.mxu0 %v3196_v27  ;;  %v3257_v27 = vld [vmem:[#allocation10 + $0x28] sm:$0xff]  }
 0x201   :  { %v1647_v31 = vpop.f32.mrb[5].mxu1  ;;  %v2796_v62 = vadd.f32 %v1645_v29, %v307_v59  ;;  %v3259_v29 = vld [vmem:[#allocation10 + $0x38] sm:$0xff]  }
 0x202   :  { %v2797_v32 = vadd.f32 %v1647_v31, %v311_v28  ;;  %v1649_v33 = vpop.f32.mrb[6].mxu1  ;;  %v3258_v28 = vld [vmem:[#allocation10 + $0x30] sm:$0xff]   ;;  %v2715_v31 = vld [vmem:[%s3595_s5 + $0x6] ss:$0 sm:$0xff] }
 0x203   :  { %v1650_v34 = vpop.f32.mrb[7].mxu1  ;;  %2101 = vmatpush1.bf16.msra.mxu0 %v3194_v30  ;;  %v1654_v2 = vmax.f32 %v2796_v62, 0.0 }
 0x204   :  { %v1655_v35 = vmax.f32 %v2797_v32, 0.0  ;;  %2102 = vmatprep.subr.bf16.mxu0 %v3199_v0 }
 0x205   :  { %v1658_v3 = vpack.c.bf16 %v1654_v2, %v1654_v2 }
 0x206   :  { %v1659_v38 = vpack.c.bf16 %v1655_v35, %v1655_v35 }
 0x207   :  { %2103 = vmatpush1.bf16.msra.mxu0 %v3197_v36 }
 0x208   :  { %2128 = vmatprep.mubr.bf16.mxu0 %v1659_v38  ;;  %2104 = vmatprep.subr.bf16.mxu0 %v3202_v37  ;;  %v2732_v38 = vld [vmem:[%s3595_s5 + $0x7] ss:$0 sm:$0xff] }
 0x20b   :  { %2105 = vmatpush1.bf16.msra.mxu0 %v3200_v39 }
 0x20c   :  { %2106 = vmatprep.subr.bf16.mxu0 %v3205_v40 }
 0x20f   :  { %2107 = vmatpush1.bf16.msra.mxu0 %v3203_v41 }
 0x210   :  { %2108 = vmatprep.subr.bf16.mxu0 %v3208_v42 }
 0x213   :  { %2109 = vmatpush1.bf16.msra.mxu0 %v3206_v43 }
 0x214   :  { %2110 = vmatprep.subr.bf16.mxu0 %v3211_v44 }
 0x217   :  { %2111 = vmatpush1.bf16.msra.mxu0 %v3209_v45 }
 0x218   :  { %2112 = vmatprep.subr.bf16.mxu0 %v3214_v46 }
 0x21b   :  { %2113 = vmatpush1.bf16.msra.mxu0 %v3212_v47 }
 0x21c   :  { %2114 = vmatprep.subr.bf16.mxu0 %v3217_v48 }
 0x21f   :  { %2115 = vmatpush1.bf16.msra.mxu0 %v3215_v49 }
 0x220   :  { %2116 = vmatprep.subr.bf16.mxu0 %v3220_v50 }
 0x223   :  { %2117 = vmatpush1.bf16.msra.mxu0 %v3218_v51 }
 0x224   :  { %2118 = vmatprep.subr.bf16.mxu0 %v3223_v52 }
 0x227   :  { %2119 = vmatpush1.bf16.msra.mxu0 %v3221_v53 }
 0x228   :  { %2120 = vmatprep.subr.bf16.mxu0 %v3226_v54 }
 0x22b   :  { %2121 = vmatpush1.bf16.msra.mxu0 %v3224_v55 }
 0x22c   :  { %2122 = vmatprep.subr.bf16.mxu0 %v3229_v57 }
 0x22f   :  { %2123 = vmatpush1.bf16.msra.mxu0 %v3227_v58 }
 0x230   :  { %2124 = vmatprep.subr.bf16.mxu0 %v3232_v60 }
 0x233   :  { %2125 = vmatpush1.bf16.msra.mxu0 %v3230_v61 }
 0x234   :  { %2126 = vmatprep.subr.bf16.mxu0 %v3235_v63 }
 0x237   :  { %2127 = vmatpush1.bf16.msra.mxu0 %v3233_v1 }
 0x23a   :  { %2129 = vmatmul.mubr.bf16.vlgmr.msra.gmra.mrb[4].mxu0 %v1658_v3 }
 0x30d   :  { %v2130_v15 = vpop.f32.mrb[4].mxu0 }
 0x30e   :  { %v2798_v17 = vadd.f32 %v2130_v15, %v1728_v13  ;;  %v2132_v18 = vpop.f32.mrb[5].mxu0 }
 0x30f   :  { %v2799_v19 = vadd.f32 %v2132_v18, %v1732_v14  ;;  %v2134_v20 = vpop.f32.mrb[6].mxu0 }
 0x310   :  { %v2137_v21 = vmax.f32 %v2798_v17, 0.0  ;;  %v2135_v22 = vpop.f32.mrb[7].mxu0 }
 0x311   :  { %v2138_v23 = vmax.f32 %v2799_v19, 0.0 }
 0x312   :  { %v2139_v25 = vpack.c.bf16 %v2137_v21, %v2137_v21 }
 0x313   :  { %v2140_v16 = vpack.c.bf16 %v2138_v23, %v2138_v23 }
 0x315   :  { %2307 = vmatprep.mubr.bf16.mxu1 %v2140_v16 }
 0x316   :  { %2308 = vmatmul.mubr.bf16.vlgmr.msra.gmra.mrb[8].mxu1 %v2139_v25 }
 0x317   :  { %2773 = vmatpush3.bf16.msra.mxu1 %v3252_v24  ;;  %2788 = vmatprep.mubr.msk.bf16.mxu1 %vm3414_vm1, %v3413_v11 }
 0x318   :  { %2774 = vmatprep.subr.bf16.mxu1 %v3413_v11 }
 0x31b   :  { %2775 = vmatpush3.bf16.msra.mxu1 %v3253_v26 }
 0x31c   :  { %2776 = vmatprep.subr.bf16.mxu1 %v3413_v11 }
 0x31f   :  { %2777 = vmatpush3.bf16.msra.mxu1 %v3254_v6 }
 0x320   :  { %2778 = vmatprep.subr.bf16.mxu1 %v3413_v11 }
 0x323   :  { %2779 = vmatpush3.bf16.msra.mxu1 %v3255_v5 }
 0x324   :  { %2780 = vmatprep.subr.bf16.mxu1 %v3413_v11 }
 0x327   :  { %2781 = vmatpush3.bf16.msra.mxu1 %v3256_v8 }
 0x328   :  { %2782 = vmatprep.subr.bf16.mxu1 %v3413_v11 }
 0x32b   :  { %2783 = vmatpush3.bf16.msra.mxu1 %v3257_v27 }
 0x32c   :  { %2784 = vmatprep.subr.bf16.mxu1 %v3413_v11 }
 0x32f   :  { %2785 = vmatpush3.bf16.msra.mxu1 %v3258_v28 }
 0x330   :  { %2786 = vmatprep.subr.bf16.mxu1 %v3413_v11 }
 0x333   :  { %2787 = vmatpush3.bf16.msra.mxu1 %v3259_v29 }
 0x3e9   :  { %v2757_v30 = vpop.f32.mrb[8].mxu1 }
 0x3ea   :  { %v2758_v0 = vpop.f32.mrb[9].mxu1 }
 0x3eb   :  { %v2759_v32 = vadd.f32 %v2758_v0, %v2757_v30  ;;  %v2760_v33 = vpop.f32.mrb[10].mxu1 }
 0x3ec   :  { %v2761_v34 = vpop.f32.mrb[11].mxu1 }
 0x3ed   :  { %v2310_v35 = vadd.f32 %v2759_v32, %v2715_v31 }
 0x3ef   :  { %v2315_v36 = vmax.f32 %v2310_v35, 0.0 }
 0x3f1   :  { %v2316_v37 = vpack.c.bf16 %v2315_v36, %v2315_v36 }
 0x3f3   :  { %2789 = vmatmul.mubr.bf16.vlgmr.msra.gmra.mrb[12].mxu1 %v2316_v37 }
 0x4c6   :  { %v2421_v39 = vpop.f32.mrb[12].mxu1 }
 0x4c7   :  { %v2422_v40 = vadd.f32 %v2732_v38, %v2421_v39  ;;  %v2790_v41 = vpop.f32.mrb[13].mxu1 }
 0x4c8   :  { %v2424_v42 = vpop.f32.mrb[14].mxu1 }
 0x4c9   :  { %v2427_v43 = vpack.c.bf16 %v2422_v40, %v2422_v40  ;;  %v2791_v44 = vpop.f32.mrb[15].mxu1 }
 0x4cb   :  { %2428 = vst [vmem:[#allocation11] sm:$0xf] %v2427_v43 }
 0x4cc   :  { %3382 = shalt.err (!%p3379_p2)
}
 0x4cd   :  { %s3383_s5 = scalar_lea.hbm %s3596_s6, 64 }
 0x4ce   :  { %p3384_p3 = scmp.ne.s32.totalorder %s3596_s6, %s3383_s5  ;;  %p3387_p4 = scmp.lt.u32.totalorder %s3383_s5, %s3596_s6 }
 0x4d0   :  { %p3389_p5 = pnand %p3387_p4, %p3384_p3 }
 0x4d2   :  { %3392 = shalt.err (!%p3389_p5)
}
 0x4d3   :  { %2438 = dma.vmem_to_hbm [thread:$0]  %s2436_s17, 64, %s3596_s6, [#allocation4]  }
 0x4d4   :  { %3399 = dma.done.wait [#allocation4], 64  }
 0x4d5   :  { %3400 = vsyncadd [#allocation4], 4294967232 }
 0x4d6   :  { %2442 = vsyncpa [#allocation3], 1 }
 0x4d7   :  { %2443 = vsyncpa [#allocation6], 1 }
 0x4d8   :  { %2444 = vsyncpa [#allocation9], 1 }
 0x4d9   :  { %2445 = vsyncpa [#allocation4], 1 }

</bundles_post_ra>
